<compile_context>
chip_gen: v7x
topology: tpu7x:2x2x1
jax: 0.10.0
libtpu: 0.0.40
codegen_flags: <defaults>
</compile_context>

<pallas_src>
import functools

import jax
import jax.numpy as jnp
from jax.experimental import pallas as pl
from jax.experimental.pallas import tpu as pltpu

LEAKY_SLOPE = 0.01  # torch.nn.LeakyReLU default negative_slope
LANES = 128         # vreg lane width
SUBLANES = 8        # vreg sublane width


def _round_up(x: int, m: int) -> int:
    return ((x + m - 1) // m) * m


# ---------------------------------------------------------------------------
# Fused kernel: entire ResFNN for one batch tile.
#   refs = (x_ref, w0, b0, w1, b1, ..., wL, bL, out_ref)
# Weights arrive already in the compute dtype (pre-cast in the wrapper);
# biases are f32 and feed the f32 accumulator directly.
# ---------------------------------------------------------------------------
def _fused_resfnn_kernel(*refs, residual_flags):
    x_ref = refs[0]
    out_ref = refs[-1]
    wb = refs[1:-1]
    n_hidden = len(residual_flags)

    h = x_ref[...].astype(jnp.float32)

    # Lane-pad the input inside the kernel (vreg-level concat, no HBM traffic).
    # Padded lanes stay exactly zero through the whole network (zero weight
    # rows/cols, zero bias lanes, LeakyReLU(0)=0, tanh(0)=0).
    d_in_pad = wb[0].shape[0]
    if d_in_pad > h.shape[1]:
        h = jnp.concatenate(
            [h, jnp.zeros((h.shape[0], d_in_pad - h.shape[1]), jnp.float32)],
            axis=-1)

    # Residual blocks: y = LeakyReLU(h @ W + b); h = h + y if dims match.
    for layer in range(n_hidden):
        w = wb[2 * layer][...]          # compute dtype (pre-cast in wrapper)
        b = wb[2 * layer + 1][...]      # f32
        y = jnp.dot(h.astype(w.dtype), w,
                    preferred_element_type=jnp.float32) + b
        y = jnp.where(y >= 0, y, LEAKY_SLOPE * y)
        h = h + y if residual_flags[layer] else y

    # Output head: tanh then final Linear.
    w = wb[2 * n_hidden][...]
    b = wb[2 * n_hidden + 1][...]
    t = jnp.tanh(h)
    out = jnp.dot(t.astype(w.dtype), w,
                  preferred_element_type=jnp.float32) + b
    out_ref[...] = out.astype(out_ref.dtype)


# ---------------------------------------------------------------------------
# Parameter init (mimics PyTorch nn.Linear default: U(-k, k), k = 1/sqrt(fan_in))
# Weights are stored transposed as (in, out). Hidden widths are zero-padded to
# 128 lanes (MXU-aligned K/N); the final layer's N is left unpadded so the
# output store is not inflated. Master copies are f32.
# ---------------------------------------------------------------------------
def _init_linear(key, in_dim, out_dim, in_pad, out_pad):
    kw, kb = jax.random.split(key)
    bound = 1.0 / (in_dim ** 0.5)
    w = jax.random.uniform(kw, (in_dim, out_dim), jnp.float32, -bound, bound)
    b = jax.random.uniform(kb, (out_dim,), jnp.float32, -bound, bound)

    w_pad = jnp.zeros((in_pad, out_pad), jnp.float32).at[:in_dim, :out_dim].set(w)
    b_pad = jnp.zeros((1, out_pad), jnp.float32).at[0, :out_dim].set(b)
    return w_pad, b_pad


def init_resfnn_params(key, input_dim, output_dim, hidden_dims):
    params = []
    d_in = input_dim
    for h in hidden_dims:
        key, sub = jax.random.split(key)
        w, b = _init_linear(sub, d_in, h,
                            _round_up(d_in, LANES), _round_up(h, LANES))
        params.append({"w": w, "b": b, "in_dim": d_in, "out_dim": h,
                       "residual": (d_in == h)})
        d_in = h
    key, sub = jax.random.split(key)
    # Final head (tanh + linear): K padded to 128, N left unpadded.
    w, b = _init_linear(sub, d_in, output_dim,
                        _round_up(d_in, LANES), output_dim)
    params.append({"w": w, "b": b, "in_dim": d_in, "out_dim": output_dim,
                   "residual": False})
    return params


# ---------------------------------------------------------------------------
# Pure-JAX reference (unpadded weights) for sanity checks.
# ---------------------------------------------------------------------------
def resfnn_reference(params, x, flatten=False, compute_dtype=jnp.float32):
    if flatten:
        x = x.reshape(x.shape[0], -1)
    h = x.astype(jnp.float32)
    for p in params[:-1]:
        w = p["w"][:p["in_dim"], :p["out_dim"]]
        b = p["b"][0, :p["out_dim"]]
        y = jnp.dot(h.astype(compute_dtype), w.astype(compute_dtype),
                    preferred_element_type=jnp.float32) + b
        y = jnp.where(y >= 0, y, LEAKY_SLOPE * y)
        h = h + y if p["residual"] else y
    p = params[-1]
    w = p["w"][:p["in_dim"], :p["out_dim"]]
    b = p["b"][0, :p["out_dim"]]
    t = jnp.tanh(h)
    return jnp.dot(t.astype(compute_dtype), w.astype(compute_dtype),
                   preferred_element_type=jnp.float32) + b


# ---------------------------------------------------------------------------
# Forward: one fused pallas_call, grid over batch tiles.
# ---------------------------------------------------------------------------
def resfnn_forward(params, x, flatten=False, block_batch=512,
                   compute_dtype=jnp.bfloat16):
    if flatten:
        x = x.reshape(x.shape[0], -1)
    x = x.astype(jnp.float32)
    batch, in_dim = x.shape

    out_dim = params[-1]["out_dim"]
    d_out = params[-1]["w"].shape[1]        # == out_dim (final N unpadded)

    # --- pre-cast weights once (amortized over the whole batch grid) ---------
    itemsize = jnp.dtype(compute_dtype).itemsize
    ws = [p["w"] if p["w"].dtype == compute_dtype else p["w"].astype(compute_dtype)
          for p in params]
    bs = [p["b"] for p in params]           # biases stay f32

    resident_bytes = (sum(int(w.size) * itemsize for w in ws)
                      + sum(int(b.size) * 4 for b in bs))

    # --- guard: the all-weights-VMEM-resident design must actually fit -------
    if 2 * resident_bytes > 44 * 2 ** 20:   # conservative vs v7x 64 MiB VMEM
        # TODO(synk): tiled per-layer emit_pipeline fallback for very wide nets;
        # plain XLA keeps correctness in the meantime.
        return resfnn_reference(params, x, compute_dtype=compute_dtype)

    # --- batch tile: VMEM-budget derived, >= 2 balanced steps for v7x --------
    batch_sub = _round_up(batch, SUBLANES)
    widths = [ws[0].shape[0]] + [w.shape[1] for w in ws]
    max_width = max(widths)

    vmem_budget = 48 * 2 ** 20
    avail = vmem_budget - 2 * resident_bytes     # worst case: double-buffered weights
    per_row_bytes = 4 * (2 * in_dim + 2 * d_out + 6 * max_width)
    tb_cap = max(SUBLANES, (avail // per_row_bytes) // SUBLANES * SUBLANES)

    tb = max(SUBLANES, min(batch_sub, _round_up(block_batch, SUBLANES), tb_cap))
    # v7x has 2 TensorCores: ensure the "parallel" batch axis has >= 2 balanced
    # grid steps whenever the batch is large enough to split.
    if batch_sub >= 2 * SUBLANES and batch_sub // tb < 2:
        tb = _round_up((batch_sub + 1) // 2, SUBLANES)

    batch_pad = _round_up(batch, tb)
    if batch_pad != batch:                  # batch padding only; no lane padding
        x = jnp.pad(x, ((0, batch_pad - batch), (0, 0)))
    grid = (batch_pad // tb,)

    # --- scheduler hints ------------------------------------------------------
    flops = 2 * batch_pad * sum(int(w.shape[0]) * int(w.shape[1]) for w in ws)
    transcendentals = batch_pad * int(ws[-1].shape[0])          # tanh
    bytes_accessed = (batch_pad * in_dim * 4 + resident_bytes
                      + batch_pad * d_out * 4)
    cost = pl.CostEstimate(flops=flops, transcendentals=transcendentals,
                           bytes_accessed=bytes_accessed)

    needed = (2 * resident_bytes
              + 2 * tb * in_dim * 4 + 2 * tb * d_out * 4
              + 6 * tb * max_width * 4)
    vmem_limit = int(min(64 * 2 ** 20, max(32 * 2 ** 20, 2 * needed)))

    residual_flags = tuple(bool(p["residual"]) for p in params[:-1])
    kernel = functools.partial(_fused_resfnn_kernel,
                               residual_flags=residual_flags)

    def call(single_buffer_weights):
        in_specs = [pl.BlockSpec((tb, in_dim), lambda i: (i, 0))]
        inputs = [x]
        for w, b in zip(ws, bs):
            if single_buffer_weights:
                # Constant-index blocks need no double buffering: Buffered(1)
                # halves resident weight VMEM.
                w_spec = pl.BlockSpec(w.shape, lambda i: (0, 0),
                                      pipeline_mode=pl.Buffered(1))
                b_spec = pl.BlockSpec(b.shape, lambda i: (0, 0),
                                      pipeline_mode=pl.Buffered(1))
            else:
                w_spec = pl.BlockSpec(w.shape, lambda i: (0, 0))
                b_spec = pl.BlockSpec(b.shape, lambda i: (0, 0))
            in_specs += [w_spec, b_spec]
            inputs += [w, b]

        return pl.pallas_call(
            kernel,
            out_shape=jax.ShapeDtypeStruct((batch_pad, d_out), jnp.float32),
            grid=grid,
            in_specs=in_specs,
            out_specs=pl.BlockSpec((tb, d_out), lambda i: (i, 0)),
            compiler_params=pltpu.CompilerParams(
                dimension_semantics=("parallel",),   # 2 TCs on v7x split batch
                vmem_limit_bytes=vmem_limit),
            cost_estimate=cost,
        )(*inputs)

    try:
        out = jax.block_until_ready(call(single_buffer_weights=True))
    except Exception:
        # pipeline_mode=pl.Buffered(1) not accepted by this jax/Mosaic build:
        # fall back to the default double-buffered pipeline (correct, more VMEM).
        out = call(single_buffer_weights=False)

    return out if batch_pad == batch else out[:batch]
    # TODO(synk): fp8 weight path (per-channel scales) for v7x large models.


if __name__ == "__main__":
    key = jax.random.PRNGKey(0)
    k_param, k_x = jax.random.split(key)

    batch = 24
    input_dim = 32
    hidden_dims = (32, 64, 64)   # first & third blocks have residual connections
    output_dim = 16

    params = init_resfnn_params(k_param, input_dim, output_dim, hidden_dims)
    x = jax.random.normal(k_x, (batch, input_dim), jnp.float32)

    ref = resfnn_reference(params, x)

    # f32 compute path: must match the PyTorch-equivalent reference tightly.
    out_f32 = jax.block_until_ready(
        resfnn_forward(params, x, compute_dtype=jnp.float32))
    assert out_f32.shape == (batch, output_dim)
    assert jnp.allclose(out_f32, ref, atol=1e-5, rtol=1e-5)

    # Default bf16-MXU path (f32 accumulation): expected precision loss from
    # truncating operands each layer -> looser tolerance.
    out_bf16 = jax.block_until_ready(resfnn_forward(params, x))
    assert out_bf16.shape == (batch, output_dim)
    assert jnp.allclose(out_bf16, ref, atol=7.5e-2, rtol=7.5e-2)

    print("KERNEL_OK")
</pallas_src>

<mosaic_0001>
module attributes {stable_mosaic.version = 11 : i64} {
  func.func @_fused_resfnn_kernel(%arg0: i32, %arg1: memref<16x32xf32, #tpu.memory_space<vmem>>, %arg2: memref<128x128xf32, #tpu.memory_space<vmem>>, %arg3: memref<1x128xf32, #tpu.memory_space<vmem>>, %arg4: memref<128x128xf32, #tpu.memory_space<vmem>>, %arg5: memref<1x128xf32, #tpu.memory_space<vmem>>, %arg6: memref<128x128xf32, #tpu.memory_space<vmem>>, %arg7: memref<1x128xf32, #tpu.memory_space<vmem>>, %arg8: memref<128x16xf32, #tpu.memory_space<vmem>>, %arg9: memref<1x16xf32, #tpu.memory_space<vmem>>, %arg10: memref<16x16xf32, #tpu.memory_space<vmem>>) attributes {dimension_semantics = [#tpu.dimension_semantics<parallel>], iteration_bounds = array<i64: 2>, scalar_prefetch = 0 : i64, scratch_operands = 0 : i64, tpu.core_type = #tpu.core_type<tc>, window_params = [{transform_indices = @transform_0, window_bounds = array<i64: 16, 32>}, {pipeline_mode = #tpu.pipeline_mode<synchronous>, transform_indices = @transform_1, window_bounds = array<i64: 128, 128>}, {pipeline_mode = #tpu.pipeline_mode<synchronous>, transform_indices = @transform_2, window_bounds = array<i64: 1, 128>}, {pipeline_mode = #tpu.pipeline_mode<synchronous>, transform_indices = @transform_3, window_bounds = array<i64: 128, 128>}, {pipeline_mode = #tpu.pipeline_mode<synchronous>, transform_indices = @transform_4, window_bounds = array<i64: 1, 128>}, {pipeline_mode = #tpu.pipeline_mode<synchronous>, transform_indices = @transform_5, window_bounds = array<i64: 128, 128>}, {pipeline_mode = #tpu.pipeline_mode<synchronous>, transform_indices = @transform_6, window_bounds = array<i64: 1, 128>}, {pipeline_mode = #tpu.pipeline_mode<synchronous>, transform_indices = @transform_7, window_bounds = array<i64: 128, 16>}, {pipeline_mode = #tpu.pipeline_mode<synchronous>, transform_indices = @transform_8, window_bounds = array<i64: 1, 16>}, {transform_indices = @transform_9, window_bounds = array<i64: 16, 16>}]} {
    %c0 = arith.constant 0 : index
    %c0_0 = arith.constant 0 : index
    %0 = vector.load %arg1[%c0, %c0_0] : memref<16x32xf32, #tpu.memory_space<vmem>>, vector<16x32xf32>
    %cst = arith.constant 0.000000e+00 : f32
    %1 = vector.broadcast %cst : f32 to vector<16x96xf32>
    %2 = tpu.concatenate %0, %1 in 1 : vector<16x32xf32>, vector<16x96xf32> -> vector<16x128xf32>
    %c0_1 = arith.constant 0 : index
    %c0_2 = arith.constant 0 : index
    %3 = vector.load %arg2[%c0_1, %c0_2] : memref<128x128xf32, #tpu.memory_space<vmem>>, vector<128x128xf32>
    %c0_3 = arith.constant 0 : index
    %c0_4 = arith.constant 0 : index
    %4 = vector.load %arg3[%c0_3, %c0_4] : memref<1x128xf32, #tpu.memory_space<vmem>>, vector<1x128xf32>
    %cst_5 = arith.constant dense<0.000000e+00> : vector<16x128xf32>
    %5 = tpu.matmul %2, %3, %cst_5 {dimension_numbers = #tpu.dot_dimension_numbers<[1], [0], [0], [1], [0, 0, 1, 1], [], []>} : vector<16x128xf32>, vector<128x128xf32>, vector<16x128xf32> -> vector<16x128xf32>
    %6 = vector.broadcast %4 : vector<1x128xf32> to vector<16x128xf32>
    %7 = arith.addf %5, %6 : vector<16x128xf32>
    %cst_6 = arith.constant 0.000000e+00 : f32
    %8 = vector.broadcast %cst_6 : f32 to vector<16x128xf32>
    %9 = arith.cmpf oge, %7, %8 : vector<16x128xf32>
    %cst_7 = arith.constant 0.00999999977 : f32
    %10 = vector.broadcast %cst_7 : f32 to vector<16x128xf32>
    %11 = arith.mulf %10, %7 : vector<16x128xf32>
    %12 = arith.select %9, %7, %11 : vector<16x128xi1>, vector<16x128xf32>
    %13 = arith.addf %2, %12 : vector<16x128xf32>
    %c0_8 = arith.constant 0 : index
    %c0_9 = arith.constant 0 : index
    %14 = vector.load %arg4[%c0_8, %c0_9] : memref<128x128xf32, #tpu.memory_space<vmem>>, vector<128x128xf32>
    %c0_10 = arith.constant 0 : index
    %c0_11 = arith.constant 0 : index
    %15 = vector.load %arg5[%c0_10, %c0_11] : memref<1x128xf32, #tpu.memory_space<vmem>>, vector<1x128xf32>
    %cst_12 = arith.constant dense<0.000000e+00> : vector<16x128xf32>
    %16 = tpu.matmul %13, %14, %cst_12 {dimension_numbers = #tpu.dot_dimension_numbers<[1], [0], [0], [1], [0, 0, 1, 1], [], []>} : vector<16x128xf32>, vector<128x128xf32>, vector<16x128xf32> -> vector<16x128xf32>
    %17 = vector.broadcast %15 : vector<1x128xf32> to vector<16x128xf32>
    %18 = arith.addf %16, %17 : vector<16x128xf32>
    %cst_13 = arith.constant 0.000000e+00 : f32
    %19 = vector.broadcast %cst_13 : f32 to vector<16x128xf32>
    %20 = arith.cmpf oge, %18, %19 : vector<16x128xf32>
    %cst_14 = arith.constant 0.00999999977 : f32
    %21 = vector.broadcast %cst_14 : f32 to vector<16x128xf32>
    %22 = arith.mulf %21, %18 : vector<16x128xf32>
    %23 = arith.select %20, %18, %22 : vector<16x128xi1>, vector<16x128xf32>
    %c0_15 = arith.constant 0 : index
    %c0_16 = arith.constant 0 : index
    %24 = vector.load %arg6[%c0_15, %c0_16] : memref<128x128xf32, #tpu.memory_space<vmem>>, vector<128x128xf32>
    %c0_17 = arith.constant 0 : index
    %c0_18 = arith.constant 0 : index
    %25 = vector.load %arg7[%c0_17, %c0_18] : memref<1x128xf32, #tpu.memory_space<vmem>>, vector<1x128xf32>
    %cst_19 = arith.constant dense<0.000000e+00> : vector<16x128xf32>
    %26 = tpu.matmul %23, %24, %cst_19 {dimension_numbers = #tpu.dot_dimension_numbers<[1], [0], [0], [1], [0, 0, 1, 1], [], []>} : vector<16x128xf32>, vector<128x128xf32>, vector<16x128xf32> -> vector<16x128xf32>
    %27 = vector.broadcast %25 : vector<1x128xf32> to vector<16x128xf32>
    %28 = arith.addf %26, %27 : vector<16x128xf32>
    %cst_20 = arith.constant 0.000000e+00 : f32
    %29 = vector.broadcast %cst_20 : f32 to vector<16x128xf32>
    %30 = arith.cmpf oge, %28, %29 : vector<16x128xf32>
    %cst_21 = arith.constant 0.00999999977 : f32
    %31 = vector.broadcast %cst_21 : f32 to vector<16x128xf32>
    %32 = arith.mulf %31, %28 : vector<16x128xf32>
    %33 = arith.select %30, %28, %32 : vector<16x128xi1>, vector<16x128xf32>
    %34 = arith.addf %23, %33 : vector<16x128xf32>
    %c0_22 = arith.constant 0 : index
    %c0_23 = arith.constant 0 : index
    %35 = vector.load %arg8[%c0_22, %c0_23] : memref<128x16xf32, #tpu.memory_space<vmem>>, vector<128x16xf32>
    %c0_24 = arith.constant 0 : index
    %c0_25 = arith.constant 0 : index
    %36 = vector.load %arg9[%c0_24, %c0_25] : memref<1x16xf32, #tpu.memory_space<vmem>>, vector<1x16xf32>
    %37 = math.tanh %34 : vector<16x128xf32>
    %cst_26 = arith.constant dense<0.000000e+00> : vector<16x16xf32>
    %38 = tpu.matmul %37, %35, %cst_26 {dimension_numbers = #tpu.dot_dimension_numbers<[1], [0], [0], [1], [0, 0, 1, 1], [], []>} : vector<16x128xf32>, vector<128x16xf32>, vector<16x16xf32> -> vector<16x16xf32>
    %39 = vector.broadcast %36 : vector<1x16xf32> to vector<16x16xf32>
    %40 = arith.addf %38, %39 : vector<16x16xf32>
    %c0_27 = arith.constant 0 : index
    %c0_28 = arith.constant 0 : index
    %41 = vector.load %arg10[%c0_27, %c0_28] : memref<16x16xf32, #tpu.memory_space<vmem>>, vector<16x16xf32>
    tpu.vector_store %arg10[%c0_27, %c0_28], %40 {strides = array<i32>} : memref<16x16xf32, #tpu.memory_space<vmem>>, vector<16x16xf32>,
    return
  }
  func.func @transform_0(%arg0: i32) -> (i32, i32) {
    %c0_i32 = arith.constant 0 : i32
    %c0_i32_0 = arith.constant 0 : i32
    return %arg0, %c0_i32 : i32, i32
  }
  func.func @transform_1(%arg0: i32) -> (i32, i32) {
    %c0_i32 = arith.constant 0 : i32
    %c0_i32_0 = arith.constant 0 : i32
    %c0_i32_1 = arith.constant 0 : i32
    return %c0_i32, %c0_i32_0 : i32, i32
  }
  func.func @transform_2(%arg0: i32) -> (i32, i32) {
    %c0_i32 = arith.constant 0 : i32
    %c0_i32_0 = arith.constant 0 : i32
    %c0_i32_1 = arith.constant 0 : i32
    return %c0_i32, %c0_i32_0 : i32, i32
  }
  func.func @transform_3(%arg0: i32) -> (i32, i32) {
    %c0_i32 = arith.constant 0 : i32
    %c0_i32_0 = arith.constant 0 : i32
    %c0_i32_1 = arith.constant 0 : i32
    return %c0_i32, %c0_i32_0 : i32, i32
  }
  func.func @transform_4(%arg0: i32) -> (i32, i32) {
    %c0_i32 = arith.constant 0 : i32
    %c0_i32_0 = arith.constant 0 : i32
    %c0_i32_1 = arith.constant 0 : i32
    return %c0_i32, %c0_i32_0 : i32, i32
  }
  func.func @transform_5(%arg0: i32) -> (i32, i32) {
    %c0_i32 = arith.constant 0 : i32
    %c0_i32_0 = arith.constant 0 : i32
    %c0_i32_1 = arith.constant 0 : i32
    return %c0_i32, %c0_i32_0 : i32, i32
  }
  func.func @transform_6(%arg0: i32) -> (i32, i32) {
    %c0_i32 = arith.constant 0 : i32
    %c0_i32_0 = arith.constant 0 : i32
    %c0_i32_1 = arith.constant 0 : i32
    return %c0_i32, %c0_i32_0 : i32, i32
  }
  func.func @transform_7(%arg0: i32) -> (i32, i32) {
    %c0_i32 = arith.constant 0 : i32
    %c0_i32_0 = arith.constant 0 : i32
    %c0_i32_1 = arith.constant 0 : i32
    return %c0_i32, %c0_i32_0 : i32, i32
  }
  func.func @transform_8(%arg0: i32) -> (i32, i32) {
    %c0_i32 = arith.constant 0 : i32
    %c0_i32_0 = arith.constant 0 : i32
    %c0_i32_1 = arith.constant 0 : i32
    return %c0_i32, %c0_i32_0 : i32, i32
  }
  func.func @transform_9(%arg0: i32) -> (i32, i32) {
    %c0_i32 = arith.constant 0 : i32
    %c0_i32_0 = arith.constant 0 : i32
    return %arg0, %c0_i32 : i32, i32
  }
}

module attributes {stable_mosaic.version = 11 : i64} {
  func.func @_fused_resfnn_kernel(%arg0: i32, %arg1: memref<16x32xf32, #tpu.memory_space<vmem>>, %arg2: memref<128x128xf32, #tpu.memory_space<vmem>>, %arg3: memref<1x128xf32, #tpu.memory_space<vmem>>, %arg4: memref<128x128xf32, #tpu.memory_space<vmem>>, %arg5: memref<1x128xf32, #tpu.memory_space<vmem>>, %arg6: memref<128x128xf32, #tpu.memory_space<vmem>>, %arg7: memref<1x128xf32, #tpu.memory_space<vmem>>, %arg8: memref<128x16xf32, #tpu.memory_space<vmem>>, %arg9: memref<1x16xf32, #tpu.memory_space<vmem>>, %arg10: memref<16x16xf32, #tpu.memory_space<vmem>>) attributes {dimension_semantics = [#tpu.dimension_semantics<parallel>], iteration_bounds = array<i64: 2>, scalar_prefetch = 0 : i64, scratch_operands = 0 : i64, tpu.core_type = #tpu.core_type<tc>, window_params = [{transform_indices = @transform_0, window_bounds = array<i64: 16, 32>}, {pipeline_mode = #tpu.pipeline_mode<synchronous>, transform_indices = @transform_1, window_bounds = array<i64: 128, 128>}, {pipeline_mode = #tpu.pipeline_mode<synchronous>, transform_indices = @transform_2, window_bounds = array<i64: 1, 128>}, {pipeline_mode = #tpu.pipeline_mode<synchronous>, transform_indices = @transform_3, window_bounds = array<i64: 128, 128>}, {pipeline_mode = #tpu.pipeline_mode<synchronous>, transform_indices = @transform_4, window_bounds = array<i64: 1, 128>}, {pipeline_mode = #tpu.pipeline_mode<synchronous>, transform_indices = @transform_5, window_bounds = array<i64: 128, 128>}, {pipeline_mode = #tpu.pipeline_mode<synchronous>, transform_indices = @transform_6, window_bounds = array<i64: 1, 128>}, {pipeline_mode = #tpu.pipeline_mode<synchronous>, transform_indices = @transform_7, window_bounds = array<i64: 128, 16>}, {pipeline_mode = #tpu.pipeline_mode<synchronous>, transform_indices = @transform_8, window_bounds = array<i64: 1, 16>}, {transform_indices = @transform_9, window_bounds = array<i64: 16, 16>}]} {
    %c0 = arith.constant 0 : index
    %c0_0 = arith.constant 0 : index
    %0 = vector.load %arg1[%c0, %c0_0] : memref<16x32xf32, #tpu.memory_space<vmem>>, vector<16x32xf32>
    %cst = arith.constant 0.000000e+00 : f32
    %1 = vector.broadcast %cst : f32 to vector<16x96xf32>
    %2 = tpu.concatenate %0, %1 in 1 : vector<16x32xf32>, vector<16x96xf32> -> vector<16x128xf32>
    %c0_1 = arith.constant 0 : index
    %c0_2 = arith.constant 0 : index
    %3 = vector.load %arg2[%c0_1, %c0_2] : memref<128x128xf32, #tpu.memory_space<vmem>>, vector<128x128xf32>
    %c0_3 = arith.constant 0 : index
    %c0_4 = arith.constant 0 : index
    %4 = vector.load %arg3[%c0_3, %c0_4] : memref<1x128xf32, #tpu.memory_space<vmem>>, vector<1x128xf32>
    %cst_5 = arith.constant dense<0.000000e+00> : vector<16x128xf32>
    %5 = tpu.matmul %2, %3, %cst_5 {dimension_numbers = #tpu.dot_dimension_numbers<[1], [0], [0], [1], [0, 0, 1, 1], [], []>} : vector<16x128xf32>, vector<128x128xf32>, vector<16x128xf32> -> vector<16x128xf32>
    %6 = vector.broadcast %4 : vector<1x128xf32> to vector<16x128xf32>
    %7 = arith.addf %5, %6 : vector<16x128xf32>
    %cst_6 = arith.constant 0.000000e+00 : f32
    %8 = vector.broadcast %cst_6 : f32 to vector<16x128xf32>
    %9 = arith.cmpf oge, %7, %8 : vector<16x128xf32>
    %cst_7 = arith.constant 0.00999999977 : f32
    %10 = vector.broadcast %cst_7 : f32 to vector<16x128xf32>
    %11 = arith.mulf %10, %7 : vector<16x128xf32>
    %12 = arith.select %9, %7, %11 : vector<16x128xi1>, vector<16x128xf32>
    %13 = arith.addf %2, %12 : vector<16x128xf32>
    %c0_8 = arith.constant 0 : index
    %c0_9 = arith.constant 0 : index
    %14 = vector.load %arg4[%c0_8, %c0_9] : memref<128x128xf32, #tpu.memory_space<vmem>>, vector<128x128xf32>
    %c0_10 = arith.constant 0 : index
    %c0_11 = arith.constant 0 : index
    %15 = vector.load %arg5[%c0_10, %c0_11] : memref<1x128xf32, #tpu.memory_space<vmem>>, vector<1x128xf32>
    %cst_12 = arith.constant dense<0.000000e+00> : vector<16x128xf32>
    %16 = tpu.matmul %13, %14, %cst_12 {dimension_numbers = #tpu.dot_dimension_numbers<[1], [0], [0], [1], [0, 0, 1, 1], [], []>} : vector<16x128xf32>, vector<128x128xf32>, vector<16x128xf32> -> vector<16x128xf32>
    %17 = vector.broadcast %15 : vector<1x128xf32> to vector<16x128xf32>
    %18 = arith.addf %16, %17 : vector<16x128xf32>
    %cst_13 = arith.constant 0.000000e+00 : f32
    %19 = vector.broadcast %cst_13 : f32 to vector<16x128xf32>
    %20 = arith.cmpf oge, %18, %19 : vector<16x128xf32>
    %cst_14 = arith.constant 0.00999999977 : f32
    %21 = vector.broadcast %cst_14 : f32 to vector<16x128xf32>
    %22 = arith.mulf %21, %18 : vector<16x128xf32>
    %23 = arith.select %20, %18, %22 : vector<16x128xi1>, vector<16x128xf32>
    %c0_15 = arith.constant 0 : index
    %c0_16 = arith.constant 0 : index
    %24 = vector.load %arg6[%c0_15, %c0_16] : memref<128x128xf32, #tpu.memory_space<vmem>>, vector<128x128xf32>
    %c0_17 = arith.constant 0 : index
    %c0_18 = arith.constant 0 : index
    %25 = vector.load %arg7[%c0_17, %c0_18] : memref<1x128xf32, #tpu.memory_space<vmem>>, vector<1x128xf32>
    %cst_19 = arith.constant dense<0.000000e+00> : vector<16x128xf32>
    %26 = tpu.matmul %23, %24, %cst_19 {dimension_numbers = #tpu.dot_dimension_numbers<[1], [0], [0], [1], [0, 0, 1, 1], [], []>} : vector<16x128xf32>, vector<128x128xf32>, vector<16x128xf32> -> vector<16x128xf32>
    %27 = vector.broadcast %25 : vector<1x128xf32> to vector<16x128xf32>
    %28 = arith.addf %26, %27 : vector<16x128xf32>
    %cst_20 = arith.constant 0.000000e+00 : f32
    %29 = vector.broadcast %cst_20 : f32 to vector<16x128xf32>
    %30 = arith.cmpf oge, %28, %29 : vector<16x128xf32>
    %cst_21 = arith.constant 0.00999999977 : f32
    %31 = vector.broadcast %cst_21 : f32 to vector<16x128xf32>
    %32 = arith.mulf %31, %28 : vector<16x128xf32>
    %33 = arith.select %30, %28, %32 : vector<16x128xi1>, vector<16x128xf32>
    %34 = arith.addf %23, %33 : vector<16x128xf32>
    %c0_22 = arith.constant 0 : index
    %c0_23 = arith.constant 0 : index
    %35 = vector.load %arg8[%c0_22, %c0_23] : memref<128x16xf32, #tpu.memory_space<vmem>>, vector<128x16xf32>
    %c0_24 = arith.constant 0 : index
    %c0_25 = arith.constant 0 : index
    %36 = vector.load %arg9[%c0_24, %c0_25] : memref<1x16xf32, #tpu.memory_space<vmem>>, vector<1x16xf32>
    %37 = math.tanh %34 : vector<16x128xf32>
    %cst_26 = arith.constant dense<0.000000e+00> : vector<16x16xf32>
    %38 = tpu.matmul %37, %35, %cst_26 {dimension_numbers = #tpu.dot_dimension_numbers<[1], [0], [0], [1], [0, 0, 1, 1], [], []>} : vector<16x128xf32>, vector<128x16xf32>, vector<16x16xf32> -> vector<16x16xf32>
    %39 = vector.broadcast %36 : vector<1x16xf32> to vector<16x16xf32>
    %40 = arith.addf %38, %39 : vector<16x16xf32>
    %c0_27 = arith.constant 0 : index
    %c0_28 = arith.constant 0 : index
    %41 = vector.load %arg10[%c0_27, %c0_28] : memref<16x16xf32, #tpu.memory_space<vmem>>, vector<16x16xf32>
    tpu.vector_store %arg10[%c0_27, %c0_28], %40 {strides = array<i32>} : memref<16x16xf32, #tpu.memory_space<vmem>>, vector<16x16xf32>,
    return
  }
  func.func @transform_0(%arg0: i32) -> (i32, i32) {
    %c0_i32 = arith.constant 0 : i32
    %c0_i32_0 = arith.constant 0 : i32
    return %arg0, %c0_i32 : i32, i32
  }
  func.func @transform_1(%arg0: i32) -> (i32, i32) {
    %c0_i32 = arith.constant 0 : i32
    %c0_i32_0 = arith.constant 0 : i32
    %c0_i32_1 = arith.constant 0 : i32
    return %c0_i32, %c0_i32_0 : i32, i32
  }
  func.func @transform_2(%arg0: i32) -> (i32, i32) {
    %c0_i32 = arith.constant 0 : i32
    %c0_i32_0 = arith.constant 0 : i32
    %c0_i32_1 = arith.constant 0 : i32
    return %c0_i32, %c0_i32_0 : i32, i32
  }
  func.func @transform_3(%arg0: i32) -> (i32, i32) {
    %c0_i32 = arith.constant 0 : i32
    %c0_i32_0 = arith.constant 0 : i32
    %c0_i32_1 = arith.constant 0 : i32
    return %c0_i32, %c0_i32_0 : i32, i32
  }
  func.func @transform_4(%arg0: i32) -> (i32, i32) {
    %c0_i32 = arith.constant 0 : i32
    %c0_i32_0 = arith.constant 0 : i32
    %c0_i32_1 = arith.constant 0 : i32
    return %c0_i32, %c0_i32_0 : i32, i32
  }
  func.func @transform_5(%arg0: i32) -> (i32, i32) {
    %c0_i32 = arith.constant 0 : i32
    %c0_i32_0 = arith.constant 0 : i32
    %c0_i32_1 = arith.constant 0 : i32
    return %c0_i32, %c0_i32_0 : i32, i32
  }
  func.func @transform_6(%arg0: i32) -> (i32, i32) {
    %c0_i32 = arith.constant 0 : i32
    %c0_i32_0 = arith.constant 0 : i32
    %c0_i32_1 = arith.constant 0 : i32
    return %c0_i32, %c0_i32_0 : i32, i32
  }
  func.func @transform_7(%arg0: i32) -> (i32, i32) {
    %c0_i32 = arith.constant 0 : i32
    %c0_i32_0 = arith.constant 0 : i32
    %c0_i32_1 = arith.constant 0 : i32
    return %c0_i32, %c0_i32_0 : i32, i32
  }
  func.func @transform_8(%arg0: i32) -> (i32, i32) {
    %c0_i32 = arith.constant 0 : i32
    %c0_i32_0 = arith.constant 0 : i32
    %c0_i32_1 = arith.constant 0 : i32
    return %c0_i32, %c0_i32_0 : i32, i32
  }
  func.func @transform_9(%arg0: i32) -> (i32, i32) {
    %c0_i32 = arith.constant 0 : i32
    %c0_i32_0 = arith.constant 0 : i32
    return %arg0, %c0_i32 : i32, i32
  }
}

</mosaic_0001>

<bundles_post_ra>
// kernel: tpu_custom_call.1
= control target key start
LH: loop header
LB: loop body
LE: loop exit
PB: predicated region body
PF: predicated region fallthrough
CT: control target
= control target key end

     0   :  { %14 = vsyncpa [#allocation3], 0  ;;  %s1815_s0 = inlined_call_operand.hbm [shape: f32[32,32], index: 0, kind: input, shape index: {}]   ;;  %s1816_s1 = inlined_call_operand.vmem [shape: f32[128,128], index: 1, kind: input, shape index: {}]   ;;  %s1817_s2 = inlined_call_operand.vmem [shape: f32[1,128], index: 2, kind: input, shape index: {}]   ;;  %s1818_s3 = inlined_call_operand.hbm [shape: f32[128,128], index: 3, kind: input, shape index: {}]   ;;  %s1819_s4 = inlined_call_operand.vmem [shape: f32[1,128], index: 4, kind: input, shape index: {}]   ;;  %s1820_s5 = inlined_call_operand.hbm [shape: f32[128,128], index: 5, kind: input, shape index: {}]   ;;  %s1821_s6 = inlined_call_operand.vmem [shape: f32[1,128], index: 6, kind: input, shape index: {}]   ;;  %s1822_s7 = inlined_call_operand.vmem [shape: f32[128,16], index: 7, kind: input, shape index: {}]   ;;  %s1823_s8 = inlined_call_operand.vmem [shape: f32[1,16], index: 8, kind: input, shape index: {}]   ;;  %s1824_s9 = inlined_call_operand.vmem [shape: f32[32,16], index: 9, kind: output, shape index: {}]  }
   0x1   :  { %16 = vsyncpa [#allocation3 + $0x1], 0 }
   0x2   :  { %17 = vsyncpa [#allocation5], 0  ;;  %s1505_s30 = smov 0   ;;  %s1507_s10 = smov 0  }
   0x3   :  { %s1509_s11 = smov 0   ;;  %s1511_s12 = smov 0  }
   0x4 LB: > { %s1829_s13 = sadd.s32 4294967295, %s1448_s12   ;;  %p43_p0 = scmp.ne.s32.totalorder %s1440_s10, %s1436_s30  ;;  %s1448_s12 = sphi %s1511_s12, %s1842_s12   ;;  %s1444_s11 = sphi %s1509_s11, %s1841_s11   ;;  %s1440_s10 = sphi %s1507_s10, %s1840_s10   ;;  %s1436_s30 = sphi %s1505_s30, %s1839_s30  }
   0x5   : > { %p1527_p1 = scmp.eq.s32.totalorder %s1829_s13, 0  ;;  %p896_p2 = scmp.ge.s32.totalorder %s1448_s12, 1 }
   0x6   : > { %p248_p3 = scmp.lt.s32.totalorder %s1448_s12, 3  ;;  %s1450_s17 = smov [#allocation4]  }
   0x7   : > { %s1830_s14 = scalar_select %p1527_p1, 1, 0 }
   0x8   : > { %p1535_p4 = por %p1527_p1, %p43_p0  ;;  %p1539_p5 = pnand %p896_p2, %p248_p3 }
   0x9   : > { %s266_s18 = sshll.u32 %s1450_s17, 4  ;;  %s1451_s20 = smov [#allocation6]   ;;  %s267_s18 = int_to_ptr.vmem [resolvable:$true] %s266_s18 }
   0xa   : > { %s1831_s15 = scalar_select %p1535_p4, 1, 0 }
   0xb   : > { %s1832_s16 = scalar_select %p1539_p5, 1, 0 }
   0xc   : > { %p1268_p6 = pneg %p1539_p5  ;;  %s282_s21 = sshll.u32 %s1451_s20, 4  ;;  %s1551_s21 = int_to_ptr.vmem [resolvable:$true] %s282_s21 }
   0xd   : > { %s1324_s24 = scalar_lea.hbm %s1818_s3, 2048 }
   0xe   : > { %p1547_p7 = pnand %p1268_p6, %p1527_p1  ;;  %p1325_p8 = scmp.ne.s32.totalorder %s1818_s3, %s1324_s24 }
   0xf   : > { %p1331_p12 = scmp.lt.u32.totalorder %s1324_s24, %s1818_s3 }
  0x10   : > { %p1326_p9 = pneg %p1547_p7 }
  0x12   : > { %p1327_p10 = pnand %p1326_p9, %p1325_p8 }
  0x14   : > { %p1328_p11 = pneg %p1327_p10 }
  0x16   : > { %p1333_p13 = pnand %p1331_p12, %p1328_p11 }
  0x18   : > { %1336 = shalt.err (!%p1333_p13)
}
  0x19   : > { %s1337_s29 = scalar_lea.vmem %s267_s18, 2048  ;;  %p1345_p6 = scmp.lt.s32.totalorder %s267_s18, %s267_s18 }
  0x1a   : > { %p1338_p0 = scmp.ne.s32.totalorder %s267_s18, %s1337_s29  ;;  %p1346_p1 = scmp.lt.s32.totalorder %s1337_s29, %s1337_s29 }
  0x1c   : > { %p1340_p2 = pnand %p1338_p0, %p1326_p9  ;;  %p1347_p4 = por %p1346_p1, %p1345_p6 }
  0x1e   : > { %p1341_p3 = pneg %p1340_p2 }
  0x20   : > { %p1348_p5 = pnand %p1347_p4, %p1341_p3 }
  0x22   : > { %1351 = shalt.err (!%p1348_p5)
}
  0x23   : > { %s1452_s30 = smov 128   ;;  %s1453_s17 = smov 8  }
  0x24   : > { %1271 = dma.hbm_to_vmem [thread:$0]  (!%p1547_p7), %s1818_s3, 2048, %s267_s18, [#allocation5], %s1452_s30, %s1452_s30, %s1453_s17  }
  0x25   : > { %s1352_s25 = scalar_lea.hbm %s1820_s5, 2048 }
  0x26   : > { %p1353_p1 = scmp.ne.s32.totalorder %s1820_s5, %s1352_s25  ;;  %p1359_p8 = scmp.lt.u32.totalorder %s1352_s25, %s1820_s5 }
  0x28   : > { %p1355_p4 = pnand %p1353_p1, %p1326_p9 }
  0x2a   : > { %p1356_p5 = pneg %p1355_p4 }
  0x2c   : > { %p1361_p10 = pnand %p1359_p8, %p1356_p5 }
  0x2e   : > { %1364 = shalt.err (!%p1361_p10)
}
  0x2f   : > { %s1365_s18 = scalar_lea.vmem %s1551_s21, 2048  ;;  %p1373_p0 = scmp.lt.s32.totalorder %s1551_s21, %s1551_s21 }
  0x30   : > { %p1366_p11 = scmp.ne.s32.totalorder %s1551_s21, %s1365_s18  ;;  %p1374_p2 = scmp.lt.s32.totalorder %s1365_s18, %s1365_s18 }
  0x32   : > { %p1368_p12 = pnand %p1366_p11, %p1326_p9  ;;  %p1375_p3 = por %p1374_p2, %p1373_p0 }
  0x34   : > { %p1369_p13 = pneg %p1368_p12 }
  0x36   : > { %p1376_p6 = pnand %p1375_p3, %p1369_p13 }
  0x38   : > { %1379 = shalt.err (!%p1376_p6)
}
  0x39   : > { %1274 = dma.hbm_to_vmem [thread:$0]  (!%p1547_p7), %s1820_s5, 2048, %s1551_s21, [#allocation5], %s1452_s30, %s1452_s30, %s1453_s17  }
  0x3a   : > { %s1607_s23 = sadd.s32 1, %s1448_s12   ;;  %s30_s19 = sadd.s32 1, %s1444_s11 }
  0x3b   : > { %s27_s24 = ssub.s32 %s1448_s12, %s1607_s23  ;;  %p37_p9 = scmp.ne.s32.totalorder %s1444_s11, %s1440_s10 }
  0x3c   : > { %p28_p1 = scmp.eq.s32.totalorder %s27_s24, 0  ;;  %p38_p4 = scmp.eq.s32.totalorder %s1448_s12, 0 }
  0x3d   : > { %p1281_p5 = scmp.lt.s32.totalorder %s1448_s12, 2  ;;  %s305_s25 = sand.u32 1, %s1444_s11  }
  0x3e   : > { %s1618_s26 = scalar_select %p28_p1, %s1444_s11, %s30_s19  }
  0x3f   : > { %p39_p8 = por %p38_p4, %p37_p9  ;;  %s900_s27 = sshll.u32 %s305_s25, 4 }
  0x40   : > { %s917_s28 = sshll.u32 %s1448_s12, 8  ;;  %s309_s21 = scalar_lea.vmem [#allocation2], %s900_s27 }
  0x41   : > { %s1624_s20 = scalar_lea.hbm %s1815_s0, %s917_s28  ;;  %s316_s22 = sshll.u32 %s309_s21, 4  ;;  %s1630_s22 = int_to_ptr.vmem [resolvable:$true] %s316_s22 }
  0x42   : > { %p1626_p7 = pnand %p1281_p5, %p39_p8  ;;  %s1632_s19 = scalar_lea.sflag [#allocation3], %s305_s25 }
  0x43   : > { %s1380_s13 = scalar_lea.hbm %s1624_s20, 256  ;;  %s1385_s29 = scalar_lea.hbm %s1815_s0, 512 }
  0x44   : > { %p1381_p10 = scmp.ne.s32.totalorder %s1624_s20, %s1380_s13  ;;  %p1382_p11 = pneg %p1626_p7 }
  0x45   : > { %p1386_p0 = scmp.lt.u32.totalorder %s1624_s20, %s1815_s0  ;;  %p1387_p2 = scmp.lt.u32.totalorder %s1385_s29, %s1380_s13 }
  0x46   : > { %p1383_p12 = pnand %p1382_p11, %p1381_p10  ;;  %p1389_p6 = scmp.lt.u32.totalorder %s1380_s13, %s1624_s20 }
  0x47   : > { %p1388_p3 = por %p1387_p2, %p1386_p0 }
  0x48   : > { %p1384_p13 = pneg %p1383_p12 }
  0x49   : > { %p1390_p9 = por %p1389_p6, %p1388_p3 }
  0x4b   : > { %p1391_p1 = pnand %p1390_p9, %p1384_p13 }
  0x4d   : > { %1394 = shalt.err (!%p1391_p1)
}
  0x4e   : > { %s1395_s25 = scalar_lea.vmem %s1630_s22, 256  ;;  %s1454_s27 = smov [#allocation2]  }
  0x4f   : > { %p1396_p4 = scmp.ne.s32.totalorder %s1630_s22, %s1395_s25  ;;  %s1400_s28 = sshll.u32 %s1454_s27, 4  ;;  %s1401_s28 = int_to_ptr.vmem [resolvable:$false] %s1400_s28 }
  0x50   : > { %s1402_s18 = scalar_lea.vmem %s1401_s28, 512  ;;  %p1403_p10 = scmp.lt.s32.totalorder %s1630_s22, %s1401_s28 }
  0x51   : > { %p1398_p5 = pnand %p1396_p4, %p1382_p11  ;;  %p1404_p12 = scmp.lt.s32.totalorder %s1402_s18, %s1395_s25 }
  0x53   : > { %p1399_p8 = pneg %p1398_p5  ;;  %p1405_p0 = por %p1404_p12, %p1403_p10 }
  0x55   : > { %p1406_p2 = pnand %p1405_p0, %p1399_p8 }
  0x57   : > { %1409 = shalt.err (!%p1406_p2)
}
  0x58   : > { %1278 = dma.hbm_to_vmem [thread:$0]  (!%p1626_p7), %s1624_s20, 256, %s1630_s22, %s1632_s19, %s1452_s30, %s1452_s30, %s1453_s17  }
  0x59   : > { %p1835_p11 = scmp.ne.s32.totalorder %s1832_s16, 0 }
  0x5a   : > { %s330_s13 = sand.u32 (!%p1835_p11), 1, %s1440_s10   ;;  %p1836_p13 = scmp.ne.s32.totalorder (!%p1835_p11), %s1831_s15, 0 }
  0x5b   : > { %328 = sbr.rel (%p1835_p11) target bundleno = 1025 (0x401), region = 56  ;;  %s1666_s29 = sshll.u32 (!%p1835_p11), %s330_s13, 4 }
  0x5c   : > { %s331_s21 = scalar_lea.sflag (!%p1835_p11), [#allocation3], %s330_s13  ;;  %s334_s25 = scalar_lea.vmem (!%p1835_p11), [#allocation2], %s1666_s29 }
  0x62   : > { %1427 = dma.done.wait (%p1836_p13), %s331_s21, 256  }
  0x63   : > { %1429 = vsyncadd (%p1836_p13), %s331_s21, 4294967040  ;;  %p1837_p3 = scmp.ne.s32.totalorder %s1830_s14, 0 }
  0x65   : > { %1431 = dma.done.wait (%p1837_p3), [#allocation5], 4096  }
  0x66   : > { %1433 = vsyncadd (%p1837_p3), [#allocation5], 4294963200  ;;  %v389_v0 = vld [vmem:[%s1816_s1] sm:$0xff]  ;;  %v390_v1 = vld [vmem:[%s1816_s1 + $0x8] sm:$0xff]  ;;  %vm386_vm0 = vcmask 261120   ;;  %s1838_s14 = sadd.s32 4294967295, %s1448_s12  }
  0x67   : > { %v391_v2 = vld [vmem:[%s1816_s1 + $0x10] sm:$0xff]  ;;  %v1130_v3 = vpack.c.bf16 %v390_v1, %v389_v0  ;;  %v392_v4 = vld [vmem:[%s1816_s1 + $0x18] sm:$0xff]  ;;  %v393_v6 = vld [vmem:[%s1816_s1 + $0x20] sm:$0xff]  ;;  %s907_s27 = sshll.u32 %s1838_s14, 1  ;;  %vm805_vm7 = vcmask 130048  }
  0x68   : > { %v1134_v5 = vpack.c.bf16 %v392_v4, %v391_v2  ;;  %v394_v7 = vld [vmem:[%s1816_s1 + $0x28] sm:$0xff]  ;;  %v395_v9 = vld [vmem:[%s1816_s1 + $0x30] sm:$0xff]  ;;  %v396_v10 = vld [vmem:[%s1816_s1 + $0x38] sm:$0xff]  ;;  %p379_p7 = scmp.lt.s32.totalorder %s907_s27, 3 }
  0x69   : > { %1131 = vmatprep.subr.bf16.mxu0 %v1130_v3  ;;  %v1138_v8 = vpack.c.bf16 %v394_v7, %v393_v6  ;;  %v1703_v11 = vld [vmem:[%s334_s25] sm:$0xff]  ;;  %v496_v13 = vld [vmem:[#allocation4 + $0x8] sm:$0xff]  ;;  %v498_v16 = vld [vmem:[#allocation4 + $0x18] sm:$0xff]  ;;  %v1142_v20 = vpack.c.bf16 %v396_v10, %v395_v9 }
  0x6a   : > { %1133 = vmatpush3.bf16.msra.mxu0 %v1130_v3  ;;  %1022 = vmatprep.mubr.msk.f32.mxu0 %vm386_vm0, %v1703_v11  ;;  %v495_v12 = vld [vmem:[#allocation4] sm:$0xff]  ;;  %v497_v14 = vld [vmem:[#allocation4 + $0x10] sm:$0xff]  ;;  %v500_v19 = vld [vmem:[#allocation4 + $0x28] sm:$0xff]  ;;  %s1844_s27 = smov (!%p379_p7, %s907_s27), 3 }
  0x6b   : > { %1135 = vmatprep.subr.bf16.mxu0 %v1134_v5  ;;  %v1162_v15 = vpack.c.bf16 %v496_v13, %v495_v12  ;;  %v1166_v17 = vpack.c.bf16 %v498_v16, %v497_v14  ;;  %v499_v18 = vld [vmem:[#allocation4 + $0x20] sm:$0xff]  ;;  %v398_v22 = vld [vmem:[%s1816_s1 + $0x48] sm:$0xff]  ;;  %v501_v24 = vld [vmem:[#allocation4 + $0x30] sm:$0xff]  ;;  %v387_v13 = vsel %vm386_vm0, %v1703_v11, 0.0  ;;  %s908_s28 = sshll.u32 %s1844_s27, 3 }
  0x6c   : > { %v397_v21 = vld [vmem:[%s1816_s1 + $0x40] sm:$0xff]  ;;  %v1170_v23 = vpack.c.bf16 %v500_v19, %v499_v18  ;;  %v502_v25 = vld [vmem:[#allocation4 + $0x38] sm:$0xff]  ;;  %v399_v27 = vld [vmem:[%s1816_s1 + $0x50] sm:$0xff]  ;;  %s382_s30 = scalar_lea.vmem %s1824_s9, %s908_s28 }
  0x6d   : > { %1163 = vmatprep.subr.bf16.mxu1 %v1162_v15  ;;  %v1146_v26 = vpack.c.bf16 %v398_v22, %v397_v21  ;;  %v400_v28 = vld [vmem:[%s1816_s1 + $0x58] sm:$0xff]  ;;  %v1174_v29 = vpack.c.bf16 %v502_v25, %v501_v24  ;;  %v503_v30 = vld [vmem:[#allocation4 + $0x40] sm:$0xff]  ;;  %v504_v31 = vld [vmem:[#allocation4 + $0x48] sm:$0xff] }
  0x6e   : > { %1137 = vmatpush3.bf16.msra.mxu0 %v1134_v5  ;;  %1165 = vmatpush3.bf16.msra.mxu1 %v1162_v15  ;;  %v1150_v32 = vpack.c.bf16 %v400_v28, %v399_v27  ;;  %v401_v33 = vld [vmem:[%s1816_s1 + $0x60] sm:$0xff]  ;;  %v402_v34 = vld [vmem:[%s1816_s1 + $0x68] sm:$0xff]  ;;  %v1178_v35 = vpack.c.bf16 %v504_v31, %v503_v30  ;;  %v505_v36 = vld [vmem:[#allocation4 + $0x50] sm:$0xff] }
  0x6f   : > { %1139 = vmatprep.subr.bf16.mxu0 %v1138_v8  ;;  %1167 = vmatprep.subr.bf16.mxu1 %v1166_v17  ;;  %v506_v37 = vld [vmem:[#allocation4 + $0x58] sm:$0xff]  ;;  %v1154_v38 = vpack.c.bf16 %v402_v34, %v401_v33  ;;  %v403_v39 = vld [vmem:[%s1816_s1 + $0x70] sm:$0xff]  ;;  %v507_v44 = vld [vmem:[#allocation4 + $0x60] sm:$0xff] }
  0x70   : > { %v404_v40 = vld [vmem:[%s1816_s1 + $0x78] sm:$0xff]  ;;  %v1182_v41 = vpack.c.bf16 %v506_v37, %v505_v36  ;;  %v508_v45 = vld [vmem:[#allocation4 + $0x68] sm:$0xff]  ;;  %v509_v47 = vld [vmem:[#allocation4 + $0x70] sm:$0xff] }
  0x71   : > { %v1158_v42 = vpack.c.bf16 %v404_v40, %v403_v39  ;;  %v385_v43 = vld [vmem:[%s334_s25 + $0x8] sm:$0xff]  ;;  %v1186_v46 = vpack.c.bf16 %v508_v45, %v507_v44  ;;  %v599_v50 = vld [vmem:[#allocation6] sm:$0xff]  ;;  %v601_v52 = vld [vmem:[#allocation6 + $0x10] sm:$0xff] }
  0x72   : > { %1141 = vmatpush3.bf16.msra.mxu0 %v1138_v8  ;;  %1169 = vmatpush3.bf16.msra.mxu1 %v1166_v17  ;;  %v510_v48 = vld [vmem:[#allocation4 + $0x78] sm:$0xff]  ;;  %v600_v51 = vld [vmem:[#allocation6 + $0x8] sm:$0xff]  ;;  %v603_v56 = vld [vmem:[#allocation6 + $0x20] sm:$0xff]  ;;  %v388_v9 = vsel %vm386_vm0, %v385_v43, 0.0 }
  0x73   : > { %1143 = vmatprep.subr.bf16.mxu0 %v1142_v20  ;;  %1171 = vmatprep.subr.bf16.mxu1 %v1170_v23  ;;  %v1190_v49 = vpack.c.bf16 %v510_v48, %v509_v47  ;;  %v1194_v53 = vpack.c.bf16 %v600_v51, %v599_v50  ;;  %v602_v54 = vld [vmem:[#allocation6 + $0x18] sm:$0xff]  ;;  %v604_v57 = vld [vmem:[#allocation6 + $0x28] sm:$0xff]  ;;  %v605_v59 = vld [vmem:[#allocation6 + $0x30] sm:$0xff] }
  0x74   : > { %v1198_v55 = vpack.c.bf16 %v602_v54, %v601_v52  ;;  %v1202_v58 = vpack.c.bf16 %v604_v57, %v603_v56  ;;  %v606_v60 = vld [vmem:[#allocation6 + $0x38] sm:$0xff]  ;;  %v607_v62 = vld [vmem:[#allocation6 + $0x40] sm:$0xff]  ;;  %v608_v63 = vld [vmem:[#allocation6 + $0x48] sm:$0xff] }
  0x75   : > { %v1206_v61 = vpack.c.bf16 %v606_v60, %v605_v59  ;;  %v1210_v0 = vpack.c.bf16 %v608_v63, %v607_v62  ;;  %v609_v1 = vld [vmem:[#allocation6 + $0x50] sm:$0xff]  ;;  %v610_v2 = vld [vmem:[#allocation6 + $0x58] sm:$0xff]  ;;  %v909_v4 = vld [vmem:[%s1817_s2] ss:$0 sm:$0xff] }
  0x76   : > { %1145 = vmatpush3.bf16.msra.mxu0 %v1142_v20  ;;  %1173 = vmatpush3.bf16.msra.mxu1 %v1170_v23  ;;  %v1214_v3 = vpack.c.bf16 %v610_v2, %v609_v1  ;;  %v611_v18 = vld [vmem:[#allocation6 + $0x60] sm:$0xff]  ;;  %v612_v19 = vld [vmem:[#allocation6 + $0x68] sm:$0xff]  ;;  %v613_v21 = vld [vmem:[#allocation6 + $0x70] sm:$0xff] }
  0x77   : > { %1147 = vmatprep.subr.bf16.mxu0 %v1146_v26  ;;  %1175 = vmatprep.subr.bf16.mxu1 %v1174_v29  ;;  %v1218_v20 = vpack.c.bf16 %v612_v19, %v611_v18  ;;  %v614_v22 = vld [vmem:[#allocation6 + $0x78] sm:$0xff]  ;;  %v705_v11 = vld [vmem:[%s1822_s7] sm:$0xff]  ;;  %v706_v24 = vld [vmem:[%s1822_s7 + $0x8] sm:$0xff] }
  0x78   : > { %v1222_v23 = vpack.c.bf16 %v614_v22, %v613_v21  ;;  %v707_v25 = vld [vmem:[%s1822_s7 + $0x10] sm:$0xff]  ;;  %v708_v27 = vld [vmem:[%s1822_s7 + $0x18] sm:$0xff]  ;;  %v710_v30 = vld [vmem:[%s1822_s7 + $0x28] sm:$0xff] }
  0x79   : > { %v1230_v28 = vpack.c.bf16 %v708_v27, %v707_v25  ;;  %v713_v44 = vld [vmem:[%s1822_s7 + $0x40] sm:$0xff]  ;;  %v714_v45 = vld [vmem:[%s1822_s7 + $0x48] sm:$0xff]  ;;  %v715_v47 = vld [vmem:[%s1822_s7 + $0x50] sm:$0xff] }
  0x7a   : > { %1149 = vmatpush3.bf16.msra.mxu0 %v1146_v26  ;;  %1177 = vmatpush3.bf16.msra.mxu1 %v1174_v29  ;;  %v1226_v26 = vpack.c.bf16 %v706_v24, %v705_v11  ;;  %v709_v29 = vld [vmem:[%s1822_s7 + $0x20] sm:$0xff]  ;;  %v716_v48 = vld [vmem:[%s1822_s7 + $0x58] sm:$0xff]  ;;  %v718_v51 = vld [vmem:[%s1822_s7 + $0x68] sm:$0xff] }
  0x7b   : > { %1151 = vmatprep.subr.bf16.mxu0 %v1150_v32  ;;  %1179 = vmatprep.subr.bf16.mxu1 %v1178_v35  ;;  %v1234_v31 = vpack.c.bf16 %v710_v30, %v709_v29  ;;  %v717_v50 = vld [vmem:[%s1822_s7 + $0x60] sm:$0xff]  ;;  %v719_v52 = vld [vmem:[%s1822_s7 + $0x70] sm:$0xff]  ;;  %v720_v54 = vld [vmem:[%s1822_s7 + $0x78] sm:$0xff] }
  0x7c   : > { %v913_v56 = vld [vmem:[%s1821_s6] ss:$0 sm:$0xff] }
  0x7e   : > { %1153 = vmatpush3.bf16.msra.mxu0 %v1150_v32  ;;  %1181 = vmatpush3.bf16.msra.mxu1 %v1178_v35  ;;  %v912_v32 = vld [vmem:[%s1819_s4] ss:$0 sm:$0xff] }
  0x7f   : > { %1155 = vmatprep.subr.bf16.mxu0 %v1154_v38  ;;  %1183 = vmatprep.subr.bf16.mxu1 %v1182_v41 }
  0x82   : > { %1157 = vmatpush3.bf16.msra.mxu0 %v1154_v38  ;;  %1185 = vmatpush3.bf16.msra.mxu1 %v1182_v41  ;;  %v711_v41 = vld [vmem:[%s1822_s7 + $0x30] sm:$0xff] }
  0x83   : > { %1159 = vmatprep.subr.bf16.mxu0 %v1158_v42  ;;  %1187 = vmatprep.subr.bf16.mxu1 %v1186_v46 }
  0x86   : > { %1161 = vmatpush3.bf16.msra.mxu0 %v1158_v42  ;;  %1189 = vmatpush3.bf16.msra.mxu1 %v1186_v46  ;;  %v712_v42 = vld [vmem:[%s1822_s7 + $0x38] sm:$0xff]  ;;  %v1242_v46 = vpack.c.bf16 %v714_v45, %v713_v44 }
  0x87   : > { %1191 = vmatprep.subr.bf16.mxu1 %v1190_v49  ;;  %1195 = vmatprep.subr.bf16.mxu0 %v1194_v53 }
  0x89   : > { %1023 = vmatmul.mubr.msk.f32.vlgmr.msra.gmra.mrb[0].mxu0 %vm386_vm0, %v385_v43  ;;  %v1238_v43 = vpack.c.bf16 %v712_v42, %v711_v41 }
  0x8a   : > { %1193 = vmatpush3.bf16.msra.mxu1 %v1190_v49  ;;  %1197 = vmatpush3.bf16.msra.mxu0 %v1194_v53  ;;  %v1246_v49 = vpack.c.bf16 %v716_v48, %v715_v47  ;;  %v1250_v53 = vpack.c.bf16 %v718_v51, %v717_v50 }
  0x8b   : > { %1199 = vmatprep.subr.bf16.mxu0 %v1198_v55  ;;  %1227 = vmatprep.subr.bf16.mxu1 %v1226_v26 }
  0x8e   : > { %1201 = vmatpush3.bf16.msra.mxu0 %v1198_v55  ;;  %v1254_v55 = vpack.c.bf16 %v720_v54, %v719_v52 }
  0x8f   : > { %1203 = vmatprep.subr.bf16.mxu0 %v1202_v58 }
  0x92   : > { %1205 = vmatpush3.bf16.msra.mxu0 %v1202_v58 }
  0x93   : > { %1207 = vmatprep.subr.bf16.mxu0 %v1206_v61 }
  0x96   : > { %1209 = vmatpush3.bf16.msra.mxu0 %v1206_v61 }
  0x97   : > { %1211 = vmatprep.subr.bf16.mxu0 %v1210_v0 }
  0x9a   : > { %1213 = vmatpush3.bf16.msra.mxu0 %v1210_v0 }
  0x9b   : > { %1215 = vmatprep.subr.bf16.mxu0 %v1214_v3 }
  0x9e   : > { %1217 = vmatpush3.bf16.msra.mxu0 %v1214_v3 }
  0x9f   : > { %1219 = vmatprep.subr.bf16.mxu0 %v1218_v20 }
  0xa2   : > { %1221 = vmatpush3.bf16.msra.mxu0 %v1218_v20 }
  0xa3   : > { %1223 = vmatprep.subr.bf16.mxu0 %v1222_v23 }
  0xa6   : > { %1225 = vmatpush3.bf16.msra.mxu0 %v1222_v23 }
 0x15c   : > { %v1024_v5 = vpop.f32.mrb[0].mxu0 }
 0x15d   : > { %v484_v6 = vadd.f32 %v1024_v5, %v909_v4  ;;  %v478_v7 = vpop.f32.mrb[1].mxu0  ;;  %v914_v5 = vld [vmem:[%s1823_s8] ss:$0 sm:$0xff] }
 0x15e   : > { %v479_v8 = vadd.f32 %v909_v4, %v478_v7 }
 0x15f   : > { %vm488_vm1 = vcmp.ge.f32.partialorder %v484_v6, 0.0  ;;  %v490_v10 = vmul.f32 0.01, %v484_v6 }
 0x160   : > { %v489_v12 = vmul.f32 0.01, %v479_v8  ;;  %vm487_vm2 = vcmp.ge.f32.partialorder %v479_v8, 0.0 }
 0x161   : > { %v492_v14 = vsel %vm488_vm1, %v484_v6, %v490_v10 }
 0x162   : > { %v491_v15 = vsel %vm487_vm2, %v479_v8, %v489_v12  ;;  %v494_v16 = vadd.f32 %v492_v14, %v388_v9 }
 0x163   : > { %v493_v17 = vadd.f32 %v491_v15, %v387_v13 }
 0x165   : > { %1057 = vmatprep.mubr.f32.mxu1 %v493_v17 }
 0x166   : > { %1058 = vmatmul.mubr.f32.vlgmr.msra.gmra.mrb[0].mxu1 %v494_v16 }
 0x167   : > { %1229 = vmatpush3.bf16.msra.mxu1 %v1226_v26 }
 0x168   : > { %1231 = vmatprep.subr.bf16.mxu1 %v1230_v28 }
 0x16b   : > { %1233 = vmatpush3.bf16.msra.mxu1 %v1230_v28 }
 0x16c   : > { %1235 = vmatprep.subr.bf16.mxu1 %v1234_v31 }
 0x16f   : > { %1237 = vmatpush3.bf16.msra.mxu1 %v1234_v31 }
 0x170   : > { %1239 = vmatprep.subr.bf16.mxu1 %v1238_v43 }
 0x173   : > { %1241 = vmatpush3.bf16.msra.mxu1 %v1238_v43 }
 0x174   : > { %1243 = vmatprep.subr.bf16.mxu1 %v1242_v46 }
 0x177   : > { %1245 = vmatpush3.bf16.msra.mxu1 %v1242_v46 }
 0x178   : > { %1247 = vmatprep.subr.bf16.mxu1 %v1246_v49 }
 0x17b   : > { %1249 = vmatpush3.bf16.msra.mxu1 %v1246_v49 }
 0x17c   : > { %1251 = vmatprep.subr.bf16.mxu1 %v1250_v53 }
 0x17f   : > { %1253 = vmatpush3.bf16.msra.mxu1 %v1250_v53 }
 0x180   : > { %1255 = vmatprep.subr.bf16.mxu1 %v1254_v55 }
 0x183   : > { %1257 = vmatpush3.bf16.msra.mxu1 %v1254_v55 }
 0x239   : > { %v1059_v33 = vpop.f32.mrb[0].mxu1 }
 0x23a   : > { %v590_v34 = vadd.f32 %v1059_v33, %v912_v32  ;;  %v584_v35 = vpop.f32.mrb[1].mxu1 }
 0x23b   : > { %v585_v36 = vadd.f32 %v912_v32, %v584_v35 }
 0x23c   : > { %v596_v37 = vmul.f32 0.01, %v590_v34  ;;  %vm594_vm3 = vcmp.ge.f32.partialorder %v590_v34, 0.0 }
 0x23d   : > { %v595_v38 = vmul.f32 0.01, %v585_v36  ;;  %vm593_vm4 = vcmp.ge.f32.partialorder %v585_v36, 0.0 }
 0x23e   : > { %v598_v40 = vsel %vm594_vm3, %v590_v34, %v596_v37 }
 0x23f   : > { %v597_v39 = vsel %vm593_vm4, %v585_v36, %v595_v38 }
 0x240   : > { %1092 = vmatprep.mubr.f32.mxu0 %v597_v39 }
 0x241   : > { %1093 = vmatmul.mubr.f32.vlgmr.msra.gmra.mrb[2].mxu0 %v598_v40 }
 0x314   : > { %v1094_v57 = vpop.f32.mrb[2].mxu0 }
 0x315   : > { %v694_v58 = vadd.f32 %v1094_v57, %v913_v56  ;;  %v688_v59 = vpop.f32.mrb[3].mxu0 }
 0x316   : > { %v689_v60 = vadd.f32 %v913_v56, %v688_v59 }
 0x317   : > { %vm698_vm5 = vcmp.ge.f32.partialorder %v694_v58, 0.0  ;;  %v700_v61 = vmul.f32 0.01, %v694_v58 }
 0x318   : > { %vm697_vm6 = vcmp.ge.f32.partialorder %v689_v60, 0.0  ;;  %v699_v62 = vmul.f32 0.01, %v689_v60 }
 0x319   : > { %v702_v63 = vsel %vm698_vm5, %v694_v58, %v700_v61 }
 0x31a   : > { %v704_v0 = vadd.f32 %v702_v63, %v598_v40  ;;  %v701_v1 = vsel %vm697_vm6, %v689_v60, %v699_v62 }
 0x31b   : > { %v703_v2 = vadd.f32 %v701_v1, %v597_v39 }
 0x31d   : > { %1320 = vtanh.f32 %v703_v2 }
 0x31e   : > { %1322 = vtanh.f32 %v704_v0 }
 0x327   : > { %v1321_v3 = vpop.eup %1320 }
 0x328   : > { %v1323_v4 = vpop.eup %1322  ;;  %1127 = vmatprep.mubr.f32.mxu1 %v1321_v3 }
 0x329   : > { %1128 = vmatmul.mubr.f32.vlgmr.msra.gmra.mrb[2].mxu1 %v1323_v4 }
 0x3fc   : > { %v1129_v6 = vpop.f32.mrb[2].mxu1 }
 0x3fd   : > { %v796_v7 = vpop.f32.mrb[3].mxu1  ;;  %v802_v9 = vadd.f32 %v1129_v6, %v914_v5 }
 0x3fe   : > { %v797_v8 = vadd.f32 %v914_v5, %v796_v7 }
 0x3ff   : > { %807 = vst.msk [vmem:[%s382_s30 + $0x8] sm:$0xff] %vm805_vm7, %v802_v9 }
 0x400   : > { %806 = vst.msk [vmem:[%s382_s30] sm:$0xff] %vm805_vm7, %v797_v8 }
 0x401 PF: > { %p20_p6 = scmp.ge.s32.totalorder %s1607_s23, 4   ;;  %s1839_s30 = smov %s1440_s10 }
 0x402   : > { %s1840_s10 = smov %s1444_s11  ;;  %s1841_s11 = smov %s1618_s26 }
 0x403   : > { %s1842_s12 = smov %s1607_s23  ;;  %22 = sbr.rel (!%p20_p6) target bundleno = 4 (0x4), region = 104 }
 0x40a   :  { %830 = vsyncpa [#allocation3], 1 }
 0x40b   :  { %832 = vsyncpa [#allocation3 + $0x1], 1 }
 0x40c   :  { %833 = vsyncpa [#allocation5], 1 }

// kernel: tpu_custom_call.1
= control target key start
LH: loop header
LB: loop body
LE: loop exit
PB: predicated region body
PF: predicated region fallthrough
CT: control target
= control target key end

     0   :  { %14 = vsyncpa [#allocation3], 0  ;;  %s1815_s0 = inlined_call_operand.hbm [shape: f32[32,32], index: 0, kind: input, shape index: {}]   ;;  %s1816_s1 = inlined_call_operand.vmem [shape: f32[128,128], index: 1, kind: input, shape index: {}]   ;;  %s1817_s2 = inlined_call_operand.vmem [shape: f32[1,128], index: 2, kind: input, shape index: {}]   ;;  %s1818_s3 = inlined_call_operand.hbm [shape: f32[128,128], index: 3, kind: input, shape index: {}]   ;;  %s1819_s4 = inlined_call_operand.vmem [shape: f32[1,128], index: 4, kind: input, shape index: {}]   ;;  %s1820_s5 = inlined_call_operand.hbm [shape: f32[128,128], index: 5, kind: input, shape index: {}]   ;;  %s1821_s6 = inlined_call_operand.vmem [shape: f32[1,128], index: 6, kind: input, shape index: {}]   ;;  %s1822_s7 = inlined_call_operand.vmem [shape: f32[128,16], index: 7, kind: input, shape index: {}]   ;;  %s1823_s8 = inlined_call_operand.vmem [shape: f32[1,16], index: 8, kind: input, shape index: {}]   ;;  %s1824_s9 = inlined_call_operand.vmem [shape: f32[32,16], index: 9, kind: output, shape index: {}]  }
   0x1   :  { %16 = vsyncpa [#allocation3 + $0x1], 0 }
   0x2   :  { %17 = vsyncpa [#allocation5], 0  ;;  %s1505_s30 = smov 0   ;;  %s1507_s10 = smov 0  }
   0x3   :  { %s1509_s11 = smov 0   ;;  %s1511_s12 = smov 0  }
   0x4 LB: > { %s1829_s13 = sadd.s32 4294967295, %s1448_s12   ;;  %p43_p0 = scmp.ne.s32.totalorder %s1440_s10, %s1436_s30  ;;  %s1448_s12 = sphi %s1511_s12, %s1842_s12   ;;  %s1444_s11 = sphi %s1509_s11, %s1841_s11   ;;  %s1440_s10 = sphi %s1507_s10, %s1840_s10   ;;  %s1436_s30 = sphi %s1505_s30, %s1839_s30  }
   0x5   : > { %p1527_p1 = scmp.eq.s32.totalorder %s1829_s13, 0  ;;  %p896_p2 = scmp.ge.s32.totalorder %s1448_s12, 1 }
   0x6   : > { %p248_p3 = scmp.lt.s32.totalorder %s1448_s12, 3  ;;  %s1450_s17 = smov [#allocation4]  }
   0x7   : > { %s1830_s14 = scalar_select %p1527_p1, 1, 0 }
   0x8   : > { %p1535_p4 = por %p1527_p1, %p43_p0  ;;  %p1539_p5 = pnand %p896_p2, %p248_p3 }
   0x9   : > { %s266_s18 = sshll.u32 %s1450_s17, 4  ;;  %s1451_s20 = smov [#allocation6]   ;;  %s267_s18 = int_to_ptr.vmem [resolvable:$true] %s266_s18 }
   0xa   : > { %s1831_s15 = scalar_select %p1535_p4, 1, 0 }
   0xb   : > { %s1832_s16 = scalar_select %p1539_p5, 1, 0 }
   0xc   : > { %p1268_p6 = pneg %p1539_p5  ;;  %s282_s21 = sshll.u32 %s1451_s20, 4  ;;  %s1551_s21 = int_to_ptr.vmem [resolvable:$true] %s282_s21 }
   0xd   : > { %s1324_s24 = scalar_lea.hbm %s1818_s3, 2048 }
   0xe   : > { %p1547_p7 = pnand %p1268_p6, %p1527_p1  ;;  %p1325_p8 = scmp.ne.s32.totalorder %s1818_s3, %s1324_s24 }
   0xf   : > { %p1331_p12 = scmp.lt.u32.totalorder %s1324_s24, %s1818_s3 }
  0x10   : > { %p1326_p9 = pneg %p1547_p7 }
  0x12   : > { %p1327_p10 = pnand %p1326_p9, %p1325_p8 }
  0x14   : > { %p1328_p11 = pneg %p1327_p10 }
  0x16   : > { %p1333_p13 = pnand %p1331_p12, %p1328_p11 }
  0x18   : > { %1336 = shalt.err (!%p1333_p13)
}
  0x19   : > { %s1337_s29 = scalar_lea.vmem %s267_s18, 2048  ;;  %p1345_p6 = scmp.lt.s32.totalorder %s267_s18, %s267_s18 }
  0x1a   : > { %p1338_p0 = scmp.ne.s32.totalorder %s267_s18, %s1337_s29  ;;  %p1346_p1 = scmp.lt.s32.totalorder %s1337_s29, %s1337_s29 }
  0x1c   : > { %p1340_p2 = pnand %p1338_p0, %p1326_p9  ;;  %p1347_p4 = por %p1346_p1, %p1345_p6 }
  0x1e   : > { %p1341_p3 = pneg %p1340_p2 }
  0x20   : > { %p1348_p5 = pnand %p1347_p4, %p1341_p3 }
  0x22   : > { %1351 = shalt.err (!%p1348_p5)
}
  0x23   : > { %s1452_s30 = smov 128   ;;  %s1453_s17 = smov 8  }
  0x24   : > { %1271 = dma.hbm_to_vmem [thread:$0]  (!%p1547_p7), %s1818_s3, 2048, %s267_s18, [#allocation5], %s1452_s30, %s1452_s30, %s1453_s17  }
  0x25   : > { %s1352_s25 = scalar_lea.hbm %s1820_s5, 2048 }
  0x26   : > { %p1353_p1 = scmp.ne.s32.totalorder %s1820_s5, %s1352_s25  ;;  %p1359_p8 = scmp.lt.u32.totalorder %s1352_s25, %s1820_s5 }
  0x28   : > { %p1355_p4 = pnand %p1353_p1, %p1326_p9 }
  0x2a   : > { %p1356_p5 = pneg %p1355_p4 }
  0x2c   : > { %p1361_p10 = pnand %p1359_p8, %p1356_p5 }
  0x2e   : > { %1364 = shalt.err (!%p1361_p10)
}
  0x2f   : > { %s1365_s18 = scalar_lea.vmem %s1551_s21, 2048  ;;  %p1373_p0 = scmp.lt.s32.totalorder %s1551_s21, %s1551_s21 }
  0x30   : > { %p1366_p11 = scmp.ne.s32.totalorder %s1551_s21, %s1365_s18  ;;  %p1374_p2 = scmp.lt.s32.totalorder %s1365_s18, %s1365_s18 }
  0x32   : > { %p1368_p12 = pnand %p1366_p11, %p1326_p9  ;;  %p1375_p3 = por %p1374_p2, %p1373_p0 }
  0x34   : > { %p1369_p13 = pneg %p1368_p12 }
  0x36   : > { %p1376_p6 = pnand %p1375_p3, %p1369_p13 }
  0x38   : > { %1379 = shalt.err (!%p1376_p6)
}
  0x39   : > { %1274 = dma.hbm_to_vmem [thread:$0]  (!%p1547_p7), %s1820_s5, 2048, %s1551_s21, [#allocation5], %s1452_s30, %s1452_s30, %s1453_s17  }
  0x3a   : > { %s1607_s23 = sadd.s32 1, %s1448_s12   ;;  %s30_s19 = sadd.s32 1, %s1444_s11 }
  0x3b   : > { %s27_s24 = ssub.s32 %s1448_s12, %s1607_s23  ;;  %p37_p9 = scmp.ne.s32.totalorder %s1444_s11, %s1440_s10 }
  0x3c   : > { %p28_p1 = scmp.eq.s32.totalorder %s27_s24, 0  ;;  %p38_p4 = scmp.eq.s32.totalorder %s1448_s12, 0 }
  0x3d   : > { %p1281_p5 = scmp.lt.s32.totalorder %s1448_s12, 2  ;;  %s305_s25 = sand.u32 1, %s1444_s11  }
  0x3e   : > { %s1618_s26 = scalar_select %p28_p1, %s1444_s11, %s30_s19  }
  0x3f   : > { %p39_p8 = por %p38_p4, %p37_p9  ;;  %s900_s27 = sshll.u32 %s305_s25, 4 }
  0x40   : > { %s917_s28 = sshll.u32 %s1448_s12, 8  ;;  %s309_s21 = scalar_lea.vmem [#allocation2], %s900_s27 }
  0x41   : > { %s1624_s20 = scalar_lea.hbm %s1815_s0, %s917_s28  ;;  %s316_s22 = sshll.u32 %s309_s21, 4  ;;  %s1630_s22 = int_to_ptr.vmem [resolvable:$true] %s316_s22 }
  0x42   : > { %p1626_p7 = pnand %p1281_p5, %p39_p8  ;;  %s1632_s19 = scalar_lea.sflag [#allocation3], %s305_s25 }
  0x43   : > { %s1380_s13 = scalar_lea.hbm %s1624_s20, 256  ;;  %s1385_s29 = scalar_lea.hbm %s1815_s0, 512 }
  0x44   : > { %p1381_p10 = scmp.ne.s32.totalorder %s1624_s20, %s1380_s13  ;;  %p1382_p11 = pneg %p1626_p7 }
  0x45   : > { %p1386_p0 = scmp.lt.u32.totalorder %s1624_s20, %s1815_s0  ;;  %p1387_p2 = scmp.lt.u32.totalorder %s1385_s29, %s1380_s13 }
  0x46   : > { %p1383_p12 = pnand %p1382_p11, %p1381_p10  ;;  %p1389_p6 = scmp.lt.u32.totalorder %s1380_s13, %s1624_s20 }
  0x47   : > { %p1388_p3 = por %p1387_p2, %p1386_p0 }
  0x48   : > { %p1384_p13 = pneg %p1383_p12 }
  0x49   : > { %p1390_p9 = por %p1389_p6, %p1388_p3 }
  0x4b   : > { %p1391_p1 = pnand %p1390_p9, %p1384_p13 }
  0x4d   : > { %1394 = shalt.err (!%p1391_p1)
}
  0x4e   : > { %s1395_s25 = scalar_lea.vmem %s1630_s22, 256  ;;  %s1454_s27 = smov [#allocation2]  }
  0x4f   : > { %p1396_p4 = scmp.ne.s32.totalorder %s1630_s22, %s1395_s25  ;;  %s1400_s28 = sshll.u32 %s1454_s27, 4  ;;  %s1401_s28 = int_to_ptr.vmem [resolvable:$false] %s1400_s28 }
  0x50   : > { %s1402_s18 = scalar_lea.vmem %s1401_s28, 512  ;;  %p1403_p10 = scmp.lt.s32.totalorder %s1630_s22, %s1401_s28 }
  0x51   : > { %p1398_p5 = pnand %p1396_p4, %p1382_p11  ;;  %p1404_p12 = scmp.lt.s32.totalorder %s1402_s18, %s1395_s25 }
  0x53   : > { %p1399_p8 = pneg %p1398_p5  ;;  %p1405_p0 = por %p1404_p12, %p1403_p10 }
  0x55   : > { %p1406_p2 = pnand %p1405_p0, %p1399_p8 }
  0x57   : > { %1409 = shalt.err (!%p1406_p2)
}
  0x58   : > { %1278 = dma.hbm_to_vmem [thread:$0]  (!%p1626_p7), %s1624_s20, 256, %s1630_s22, %s1632_s19, %s1452_s30, %s1452_s30, %s1453_s17  }
  0x59   : > { %p1835_p11 = scmp.ne.s32.totalorder %s1832_s16, 0 }
  0x5a   : > { %s330_s13 = sand.u32 (!%p1835_p11), 1, %s1440_s10   ;;  %p1836_p13 = scmp.ne.s32.totalorder (!%p1835_p11), %s1831_s15, 0 }
  0x5b   : > { %328 = sbr.rel (%p1835_p11) target bundleno = 1025 (0x401), region = 56  ;;  %s1666_s29 = sshll.u32 (!%p1835_p11), %s330_s13, 4 }
  0x5c   : > { %s331_s21 = scalar_lea.sflag (!%p1835_p11), [#allocation3], %s330_s13  ;;  %s334_s25 = scalar_lea.vmem (!%p1835_p11), [#allocation2], %s1666_s29 }
  0x62   : > { %1427 = dma.done.wait (%p1836_p13), %s331_s21, 256  }
  0x63   : > { %1429 = vsyncadd (%p1836_p13), %s331_s21, 4294967040  ;;  %p1837_p3 = scmp.ne.s32.totalorder %s1830_s14, 0 }
  0x65   : > { %1431 = dma.done.wait (%p1837_p3), [#allocation5], 4096  }
  0x66   : > { %1433 = vsyncadd (%p1837_p3), [#allocation5], 4294963200  ;;  %v389_v0 = vld [vmem:[%s1816_s1] sm:$0xff]  ;;  %v390_v1 = vld [vmem:[%s1816_s1 + $0x8] sm:$0xff]  ;;  %vm386_vm0 = vcmask 261120   ;;  %s1838_s14 = sadd.s32 4294967295, %s1448_s12  }
  0x67   : > { %v391_v2 = vld [vmem:[%s1816_s1 + $0x10] sm:$0xff]  ;;  %v1130_v3 = vpack.c.bf16 %v390_v1, %v389_v0  ;;  %v392_v4 = vld [vmem:[%s1816_s1 + $0x18] sm:$0xff]  ;;  %v393_v6 = vld [vmem:[%s1816_s1 + $0x20] sm:$0xff]  ;;  %s907_s27 = sshll.u32 %s1838_s14, 1  ;;  %vm805_vm7 = vcmask 130048  }
  0x68   : > { %v1134_v5 = vpack.c.bf16 %v392_v4, %v391_v2  ;;  %v394_v7 = vld [vmem:[%s1816_s1 + $0x28] sm:$0xff]  ;;  %v395_v9 = vld [vmem:[%s1816_s1 + $0x30] sm:$0xff]  ;;  %v396_v10 = vld [vmem:[%s1816_s1 + $0x38] sm:$0xff]  ;;  %p379_p7 = scmp.lt.s32.totalorder %s907_s27, 3 }
  0x69   : > { %1131 = vmatprep.subr.bf16.mxu0 %v1130_v3  ;;  %v1138_v8 = vpack.c.bf16 %v394_v7, %v393_v6  ;;  %v1703_v11 = vld [vmem:[%s334_s25] sm:$0xff]  ;;  %v496_v13 = vld [vmem:[#allocation4 + $0x8] sm:$0xff]  ;;  %v498_v16 = vld [vmem:[#allocation4 + $0x18] sm:$0xff]  ;;  %v1142_v20 = vpack.c.bf16 %v396_v10, %v395_v9 }
  0x6a   : > { %1133 = vmatpush3.bf16.msra.mxu0 %v1130_v3  ;;  %1022 = vmatprep.mubr.msk.f32.mxu0 %vm386_vm0, %v1703_v11  ;;  %v495_v12 = vld [vmem:[#allocation4] sm:$0xff]  ;;  %v497_v14 = vld [vmem:[#allocation4 + $0x10] sm:$0xff]  ;;  %v500_v19 = vld [vmem:[#allocation4 + $0x28] sm:$0xff]  ;;  %s1844_s27 = smov (!%p379_p7, %s907_s27), 3 }
  0x6b   : > { %1135 = vmatprep.subr.bf16.mxu0 %v1134_v5  ;;  %v1162_v15 = vpack.c.bf16 %v496_v13, %v495_v12  ;;  %v1166_v17 = vpack.c.bf16 %v498_v16, %v497_v14  ;;  %v499_v18 = vld [vmem:[#allocation4 + $0x20] sm:$0xff]  ;;  %v398_v22 = vld [vmem:[%s1816_s1 + $0x48] sm:$0xff]  ;;  %v501_v24 = vld [vmem:[#allocation4 + $0x30] sm:$0xff]  ;;  %v387_v13 = vsel %vm386_vm0, %v1703_v11, 0.0  ;;  %s908_s28 = sshll.u32 %s1844_s27, 3 }
  0x6c   : > { %v397_v21 = vld [vmem:[%s1816_s1 + $0x40] sm:$0xff]  ;;  %v1170_v23 = vpack.c.bf16 %v500_v19, %v499_v18  ;;  %v502_v25 = vld [vmem:[#allocation4 + $0x38] sm:$0xff]  ;;  %v399_v27 = vld [vmem:[%s1816_s1 + $0x50] sm:$0xff]  ;;  %s382_s30 = scalar_lea.vmem %s1824_s9, %s908_s28 }
  0x6d   : > { %1163 = vmatprep.subr.bf16.mxu1 %v1162_v15  ;;  %v1146_v26 = vpack.c.bf16 %v398_v22, %v397_v21  ;;  %v400_v28 = vld [vmem:[%s1816_s1 + $0x58] sm:$0xff]  ;;  %v1174_v29 = vpack.c.bf16 %v502_v25, %v501_v24  ;;  %v503_v30 = vld [vmem:[#allocation4 + $0x40] sm:$0xff]  ;;  %v504_v31 = vld [vmem:[#allocation4 + $0x48] sm:$0xff] }
  0x6e   : > { %1137 = vmatpush3.bf16.msra.mxu0 %v1134_v5  ;;  %1165 = vmatpush3.bf16.msra.mxu1 %v1162_v15  ;;  %v1150_v32 = vpack.c.bf16 %v400_v28, %v399_v27  ;;  %v401_v33 = vld [vmem:[%s1816_s1 + $0x60] sm:$0xff]  ;;  %v402_v34 = vld [vmem:[%s1816_s1 + $0x68] sm:$0xff]  ;;  %v1178_v35 = vpack.c.bf16 %v504_v31, %v503_v30  ;;  %v505_v36 = vld [vmem:[#allocation4 + $0x50] sm:$0xff] }
  0x6f   : > { %1139 = vmatprep.subr.bf16.mxu0 %v1138_v8  ;;  %1167 = vmatprep.subr.bf16.mxu1 %v1166_v17  ;;  %v506_v37 = vld [vmem:[#allocation4 + $0x58] sm:$0xff]  ;;  %v1154_v38 = vpack.c.bf16 %v402_v34, %v401_v33  ;;  %v403_v39 = vld [vmem:[%s1816_s1 + $0x70] sm:$0xff]  ;;  %v507_v44 = vld [vmem:[#allocation4 + $0x60] sm:$0xff] }
  0x70   : > { %v404_v40 = vld [vmem:[%s1816_s1 + $0x78] sm:$0xff]  ;;  %v1182_v41 = vpack.c.bf16 %v506_v37, %v505_v36  ;;  %v508_v45 = vld [vmem:[#allocation4 + $0x68] sm:$0xff]  ;;  %v509_v47 = vld [vmem:[#allocation4 + $0x70] sm:$0xff] }
  0x71   : > { %v1158_v42 = vpack.c.bf16 %v404_v40, %v403_v39  ;;  %v385_v43 = vld [vmem:[%s334_s25 + $0x8] sm:$0xff]  ;;  %v1186_v46 = vpack.c.bf16 %v508_v45, %v507_v44  ;;  %v599_v50 = vld [vmem:[#allocation6] sm:$0xff]  ;;  %v601_v52 = vld [vmem:[#allocation6 + $0x10] sm:$0xff] }
  0x72   : > { %1141 = vmatpush3.bf16.msra.mxu0 %v1138_v8  ;;  %1169 = vmatpush3.bf16.msra.mxu1 %v1166_v17  ;;  %v510_v48 = vld [vmem:[#allocation4 + $0x78] sm:$0xff]  ;;  %v600_v51 = vld [vmem:[#allocation6 + $0x8] sm:$0xff]  ;;  %v603_v56 = vld [vmem:[#allocation6 + $0x20] sm:$0xff]  ;;  %v388_v9 = vsel %vm386_vm0, %v385_v43, 0.0 }
  0x73   : > { %1143 = vmatprep.subr.bf16.mxu0 %v1142_v20  ;;  %1171 = vmatprep.subr.bf16.mxu1 %v1170_v23  ;;  %v1190_v49 = vpack.c.bf16 %v510_v48, %v509_v47  ;;  %v1194_v53 = vpack.c.bf16 %v600_v51, %v599_v50  ;;  %v602_v54 = vld [vmem:[#allocation6 + $0x18] sm:$0xff]  ;;  %v604_v57 = vld [vmem:[#allocation6 + $0x28] sm:$0xff]  ;;  %v605_v59 = vld [vmem:[#allocation6 + $0x30] sm:$0xff] }
  0x74   : > { %v1198_v55 = vpack.c.bf16 %v602_v54, %v601_v52  ;;  %v1202_v58 = vpack.c.bf16 %v604_v57, %v603_v56  ;;  %v606_v60 = vld [vmem:[#allocation6 + $0x38] sm:$0xff]  ;;  %v607_v62 = vld [vmem:[#allocation6 + $0x40] sm:$0xff]  ;;  %v608_v63 = vld [vmem:[#allocation6 + $0x48] sm:$0xff] }
  0x75   : > { %v1206_v61 = vpack.c.bf16 %v606_v60, %v605_v59  ;;  %v1210_v0 = vpack.c.bf16 %v608_v63, %v607_v62  ;;  %v609_v1 = vld [vmem:[#allocation6 + $0x50] sm:$0xff]  ;;  %v610_v2 = vld [vmem:[#allocation6 + $0x58] sm:$0xff]  ;;  %v909_v4 = vld [vmem:[%s1817_s2] ss:$0 sm:$0xff] }
  0x76   : > { %1145 = vmatpush3.bf16.msra.mxu0 %v1142_v20  ;;  %1173 = vmatpush3.bf16.msra.mxu1 %v1170_v23  ;;  %v1214_v3 = vpack.c.bf16 %v610_v2, %v609_v1  ;;  %v611_v18 = vld [vmem:[#allocation6 + $0x60] sm:$0xff]  ;;  %v612_v19 = vld [vmem:[#allocation6 + $0x68] sm:$0xff]  ;;  %v613_v21 = vld [vmem:[#allocation6 + $0x70] sm:$0xff] }
  0x77   : > { %1147 = vmatprep.subr.bf16.mxu0 %v1146_v26  ;;  %1175 = vmatprep.subr.bf16.mxu1 %v1174_v29  ;;  %v1218_v20 = vpack.c.bf16 %v612_v19, %v611_v18  ;;  %v614_v22 = vld [vmem:[#allocation6 + $0x78] sm:$0xff]  ;;  %v705_v11 = vld [vmem:[%s1822_s7] sm:$0xff]  ;;  %v706_v24 = vld [vmem:[%s1822_s7 + $0x8] sm:$0xff] }
  0x78   : > { %v1222_v23 = vpack.c.bf16 %v614_v22, %v613_v21  ;;  %v707_v25 = vld [vmem:[%s1822_s7 + $0x10] sm:$0xff]  ;;  %v708_v27 = vld [vmem:[%s1822_s7 + $0x18] sm:$0xff]  ;;  %v710_v30 = vld [vmem:[%s1822_s7 + $0x28] sm:$0xff] }
  0x79   : > { %v1230_v28 = vpack.c.bf16 %v708_v27, %v707_v25  ;;  %v713_v44 = vld [vmem:[%s1822_s7 + $0x40] sm:$0xff]  ;;  %v714_v45 = vld [vmem:[%s1822_s7 + $0x48] sm:$0xff]  ;;  %v715_v47 = vld [vmem:[%s1822_s7 + $0x50] sm:$0xff] }
  0x7a   : > { %1149 = vmatpush3.bf16.msra.mxu0 %v1146_v26  ;;  %1177 = vmatpush3.bf16.msra.mxu1 %v1174_v29  ;;  %v1226_v26 = vpack.c.bf16 %v706_v24, %v705_v11  ;;  %v709_v29 = vld [vmem:[%s1822_s7 + $0x20] sm:$0xff]  ;;  %v716_v48 = vld [vmem:[%s1822_s7 + $0x58] sm:$0xff]  ;;  %v718_v51 = vld [vmem:[%s1822_s7 + $0x68] sm:$0xff] }
  0x7b   : > { %1151 = vmatprep.subr.bf16.mxu0 %v1150_v32  ;;  %1179 = vmatprep.subr.bf16.mxu1 %v1178_v35  ;;  %v1234_v31 = vpack.c.bf16 %v710_v30, %v709_v29  ;;  %v717_v50 = vld [vmem:[%s1822_s7 + $0x60] sm:$0xff]  ;;  %v719_v52 = vld [vmem:[%s1822_s7 + $0x70] sm:$0xff]  ;;  %v720_v54 = vld [vmem:[%s1822_s7 + $0x78] sm:$0xff] }
  0x7c   : > { %v913_v56 = vld [vmem:[%s1821_s6] ss:$0 sm:$0xff] }
  0x7e   : > { %1153 = vmatpush3.bf16.msra.mxu0 %v1150_v32  ;;  %1181 = vmatpush3.bf16.msra.mxu1 %v1178_v35  ;;  %v912_v32 = vld [vmem:[%s1819_s4] ss:$0 sm:$0xff] }
  0x7f   : > { %1155 = vmatprep.subr.bf16.mxu0 %v1154_v38  ;;  %1183 = vmatprep.subr.bf16.mxu1 %v1182_v41 }
  0x82   : > { %1157 = vmatpush3.bf16.msra.mxu0 %v1154_v38  ;;  %1185 = vmatpush3.bf16.msra.mxu1 %v1182_v41  ;;  %v711_v41 = vld [vmem:[%s1822_s7 + $0x30] sm:$0xff] }
  0x83   : > { %1159 = vmatprep.subr.bf16.mxu0 %v1158_v42  ;;  %1187 = vmatprep.subr.bf16.mxu1 %v1186_v46 }
  0x86   : > { %1161 = vmatpush3.bf16.msra.mxu0 %v1158_v42  ;;  %1189 = vmatpush3.bf16.msra.mxu1 %v1186_v46  ;;  %v712_v42 = vld [vmem:[%s1822_s7 + $0x38] sm:$0xff]  ;;  %v1242_v46 = vpack.c.bf16 %v714_v45, %v713_v44 }
  0x87   : > { %1191 = vmatprep.subr.bf16.mxu1 %v1190_v49  ;;  %1195 = vmatprep.subr.bf16.mxu0 %v1194_v53 }
  0x89   : > { %1023 = vmatmul.mubr.msk.f32.vlgmr.msra.gmra.mrb[0].mxu0 %vm386_vm0, %v385_v43  ;;  %v1238_v43 = vpack.c.bf16 %v712_v42, %v711_v41 }
  0x8a   : > { %1193 = vmatpush3.bf16.msra.mxu1 %v1190_v49  ;;  %1197 = vmatpush3.bf16.msra.mxu0 %v1194_v53  ;;  %v1246_v49 = vpack.c.bf16 %v716_v48, %v715_v47  ;;  %v1250_v53 = vpack.c.bf16 %v718_v51, %v717_v50 }
  0x8b   : > { %1199 = vmatprep.subr.bf16.mxu0 %v1198_v55  ;;  %1227 = vmatprep.subr.bf16.mxu1 %v1226_v26 }
  0x8e   : > { %1201 = vmatpush3.bf16.msra.mxu0 %v1198_v55  ;;  %v1254_v55 = vpack.c.bf16 %v720_v54, %v719_v52 }
  0x8f   : > { %1203 = vmatprep.subr.bf16.mxu0 %v1202_v58 }
  0x92   : > { %1205 = vmatpush3.bf16.msra.mxu0 %v1202_v58 }
  0x93   : > { %1207 = vmatprep.subr.bf16.mxu0 %v1206_v61 }
  0x96   : > { %1209 = vmatpush3.bf16.msra.mxu0 %v1206_v61 }
  0x97   : > { %1211 = vmatprep.subr.bf16.mxu0 %v1210_v0 }
  0x9a   : > { %1213 = vmatpush3.bf16.msra.mxu0 %v1210_v0 }
  0x9b   : > { %1215 = vmatprep.subr.bf16.mxu0 %v1214_v3 }
  0x9e   : > { %1217 = vmatpush3.bf16.msra.mxu0 %v1214_v3 }
  0x9f   : > { %1219 = vmatprep.subr.bf16.mxu0 %v1218_v20 }
  0xa2   : > { %1221 = vmatpush3.bf16.msra.mxu0 %v1218_v20 }
  0xa3   : > { %1223 = vmatprep.subr.bf16.mxu0 %v1222_v23 }
  0xa6   : > { %1225 = vmatpush3.bf16.msra.mxu0 %v1222_v23 }
 0x15c   : > { %v1024_v5 = vpop.f32.mrb[0].mxu0 }
 0x15d   : > { %v484_v6 = vadd.f32 %v1024_v5, %v909_v4  ;;  %v478_v7 = vpop.f32.mrb[1].mxu0  ;;  %v914_v5 = vld [vmem:[%s1823_s8] ss:$0 sm:$0xff] }
 0x15e   : > { %v479_v8 = vadd.f32 %v909_v4, %v478_v7 }
 0x15f   : > { %vm488_vm1 = vcmp.ge.f32.partialorder %v484_v6, 0.0  ;;  %v490_v10 = vmul.f32 0.01, %v484_v6 }
 0x160   : > { %v489_v12 = vmul.f32 0.01, %v479_v8  ;;  %vm487_vm2 = vcmp.ge.f32.partialorder %v479_v8, 0.0 }
 0x161   : > { %v492_v14 = vsel %vm488_vm1, %v484_v6, %v490_v10 }
 0x162   : > { %v491_v15 = vsel %vm487_vm2, %v479_v8, %v489_v12  ;;  %v494_v16 = vadd.f32 %v492_v14, %v388_v9 }
 0x163   : > { %v493_v17 = vadd.f32 %v491_v15, %v387_v13 }
 0x165   : > { %1057 = vmatprep.mubr.f32.mxu1 %v493_v17 }
 0x166   : > { %1058 = vmatmul.mubr.f32.vlgmr.msra.gmra.mrb[0].mxu1 %v494_v16 }
 0x167   : > { %1229 = vmatpush3.bf16.msra.mxu1 %v1226_v26 }
 0x168   : > { %1231 = vmatprep.subr.bf16.mxu1 %v1230_v28 }
 0x16b   : > { %1233 = vmatpush3.bf16.msra.mxu1 %v1230_v28 }
 0x16c   : > { %1235 = vmatprep.subr.bf16.mxu1 %v1234_v31 }
 0x16f   : > { %1237 = vmatpush3.bf16.msra.mxu1 %v1234_v31 }
 0x170   : > { %1239 = vmatprep.subr.bf16.mxu1 %v1238_v43 }
 0x173   : > { %1241 = vmatpush3.bf16.msra.mxu1 %v1238_v43 }
 0x174   : > { %1243 = vmatprep.subr.bf16.mxu1 %v1242_v46 }
 0x177   : > { %1245 = vmatpush3.bf16.msra.mxu1 %v1242_v46 }
 0x178   : > { %1247 = vmatprep.subr.bf16.mxu1 %v1246_v49 }
 0x17b   : > { %1249 = vmatpush3.bf16.msra.mxu1 %v1246_v49 }
 0x17c   : > { %1251 = vmatprep.subr.bf16.mxu1 %v1250_v53 }
 0x17f   : > { %1253 = vmatpush3.bf16.msra.mxu1 %v1250_v53 }
 0x180   : > { %1255 = vmatprep.subr.bf16.mxu1 %v1254_v55 }
 0x183   : > { %1257 = vmatpush3.bf16.msra.mxu1 %v1254_v55 }
 0x239   : > { %v1059_v33 = vpop.f32.mrb[0].mxu1 }
 0x23a   : > { %v590_v34 = vadd.f32 %v1059_v33, %v912_v32  ;;  %v584_v35 = vpop.f32.mrb[1].mxu1 }
 0x23b   : > { %v585_v36 = vadd.f32 %v912_v32, %v584_v35 }
 0x23c   : > { %v596_v37 = vmul.f32 0.01, %v590_v34  ;;  %vm594_vm3 = vcmp.ge.f32.partialorder %v590_v34, 0.0 }
 0x23d   : > { %v595_v38 = vmul.f32 0.01, %v585_v36  ;;  %vm593_vm4 = vcmp.ge.f32.partialorder %v585_v36, 0.0 }
 0x23e   : > { %v598_v40 = vsel %vm594_vm3, %v590_v34, %v596_v37 }
 0x23f   : > { %v597_v39 = vsel %vm593_vm4, %v585_v36, %v595_v38 }
 0x240   : > { %1092 = vmatprep.mubr.f32.mxu0 %v597_v39 }
 0x241   : > { %1093 = vmatmul.mubr.f32.vlgmr.msra.gmra.mrb[2].mxu0 %v598_v40 }
 0x314   : > { %v1094_v57 = vpop.f32.mrb[2].mxu0 }
 0x315   : > { %v694_v58 = vadd.f32 %v1094_v57, %v913_v56  ;;  %v688_v59 = vpop.f32.mrb[3].mxu0 }
 0x316   : > { %v689_v60 = vadd.f32 %v913_v56, %v688_v59 }
 0x317   : > { %vm698_vm5 = vcmp.ge.f32.partialorder %v694_v58, 0.0  ;;  %v700_v61 = vmul.f32 0.01, %v694_v58 }
 0x318   : > { %vm697_vm6 = vcmp.ge.f32.partialorder %v689_v60, 0.0  ;;  %v699_v62 = vmul.f32 0.01, %v689_v60 }
 0x319   : > { %v702_v63 = vsel %vm698_vm5, %v694_v58, %v700_v61 }
 0x31a   : > { %v704_v0 = vadd.f32 %v702_v63, %v598_v40  ;;  %v701_v1 = vsel %vm697_vm6, %v689_v60, %v699_v62 }
 0x31b   : > { %v703_v2 = vadd.f32 %v701_v1, %v597_v39 }
 0x31d   : > { %1320 = vtanh.f32 %v703_v2 }
 0x31e   : > { %1322 = vtanh.f32 %v704_v0 }
 0x327   : > { %v1321_v3 = vpop.eup %1320 }
 0x328   : > { %v1323_v4 = vpop.eup %1322  ;;  %1127 = vmatprep.mubr.f32.mxu1 %v1321_v3 }
 0x329   : > { %1128 = vmatmul.mubr.f32.vlgmr.msra.gmra.mrb[2].mxu1 %v1323_v4 }
 0x3fc   : > { %v1129_v6 = vpop.f32.mrb[2].mxu1 }
 0x3fd   : > { %v796_v7 = vpop.f32.mrb[3].mxu1  ;;  %v802_v9 = vadd.f32 %v1129_v6, %v914_v5 }
 0x3fe   : > { %v797_v8 = vadd.f32 %v914_v5, %v796_v7 }
 0x3ff   : > { %807 = vst.msk [vmem:[%s382_s30 + $0x8] sm:$0xff] %vm805_vm7, %v802_v9 }
 0x400   : > { %806 = vst.msk [vmem:[%s382_s30] sm:$0xff] %vm805_vm7, %v797_v8 }
 0x401 PF: > { %p20_p6 = scmp.ge.s32.totalorder %s1607_s23, 4   ;;  %s1839_s30 = smov %s1440_s10 }
 0x402   : > { %s1840_s10 = smov %s1444_s11  ;;  %s1841_s11 = smov %s1618_s26 }
 0x403   : > { %s1842_s12 = smov %s1607_s23  ;;  %22 = sbr.rel (!%p20_p6) target bundleno = 4 (0x4), region = 104 }
 0x40a   :  { %830 = vsyncpa [#allocation3], 1 }
 0x40b   :  { %832 = vsyncpa [#allocation3 + $0x1], 1 }
 0x40c   :  { %833 = vsyncpa [#allocation5], 1 }

</bundles_post_ra>
